<compile_context>
chip_gen: v7x
topology: tpu7x:2x2x1
jax: 0.10.0
libtpu: 0.0.40
codegen_flags: <defaults>
</compile_context>

<pallas_src>
import jax
import jax.numpy as jnp
from jax import lax
from jax.experimental import pallas as pl
from jax.experimental.pallas import tpu as pltpu

# ----------------------- synthetic config (OTFlow.__init__) ------------------
LATENT_DIM     = 16     # config.latent_dim
HIDDEN_DIM     = 32     # config.hidden_dim
N_LAYERS       = 2      # config.n_layers
TIME_EMBED_DIM = 16     # config.time_embed_dim
USE_TIME_EMB   = True   # config.use_time_embedding
SIGMA          = 0.1    # config.sigma
DROPOUT        = 0.0    # config.dropout -> Dropout(0) == Identity (eval mode)
BATCH          = 8
LN_EPS         = 1e-5   # PyTorch LayerNorm default eps
SINKHORN_REG   = 0.05   # entropic regularization (on max-normalized cost)
SINKHORN_ITERS = 100
SINK_UNROLL    = 5      # static unroll factor inside the Sinkhorn fori_loop
assert SINKHORN_ITERS % SINK_UNROLL == 0

# -------------------- static packing layout (params -> 2 slabs) ---------------
NET_DIMS = ([LATENT_DIM * (3 if USE_TIME_EMB else 2)]
            + [HIDDEN_DIM] * N_LAYERS + [LATENT_DIM])
_WPAD = max(HIDDEN_DIM, LATENT_DIM, TIME_EMBED_DIM)        # common lane width
_V_NET0 = 5 if USE_TIME_EMB else 0                         # first net row in vmat
_W_NET0 = TIME_EMBED_DIM if USE_TIME_EMB else 0            # first net row in wmat
_W_OFFS = []
_off = _W_NET0
for _d in NET_DIMS[:-1]:
    _W_OFFS.append(_off)
    _off += _d
_W_ROWS = _off
_V_ROWS = _V_NET0 + 3 * (len(NET_DIMS) - 1)


# ------------------------------ in-kernel math --------------------------------
def _erf(x):
    # Abramowitz & Stegun 7.1.26 (max abs err 1.5e-7, i.e. f32-exact here).
    # TODO(synk): lax.erf lowering in Mosaic is not guaranteed; polynomial used instead.
    a1, a2, a3, a4, a5 = (0.254829592, -0.284496736, 1.421413741,
                          -1.453152027, 1.061405429)
    p = 0.3275911
    s = jnp.where(x >= 0.0, 1.0, -1.0)
    ax = jnp.abs(x)
    tt = 1.0 / (1.0 + p * ax)
    poly = tt * (a1 + tt * (a2 + tt * (a3 + tt * (a4 + tt * a5))))
    return s * (1.0 - poly * jnp.exp(-ax * ax))


def _gelu(x):
    # PyTorch nn.GELU() default = exact erf-based GELU (kept in f32: v5e-friendly).
    return 0.5 * x * (1.0 + _erf(x * 0.7071067811865476))


def _layer_norm(x, gamma, beta):
    mu = jnp.mean(x, axis=-1, keepdims=True)
    xc = x - mu
    var = jnp.mean(xc * xc, axis=-1, keepdims=True)
    return xc * lax.rsqrt(var + LN_EPS) * gamma + beta


# ------------------------- the single fused kernel -----------------------------
def _fused_kernel(src_ref, tgt_ref, rnd_ref, wmat_ref, vmat_ref, out_ref):
    f32 = jnp.float32
    B, D = src_ref.shape

    src = src_ref[...]                    # (B, D) source minibatch
    tgt = tgt_ref[...]                    # (B, D) target minibatch
    rnd = rnd_ref[...]                    # (B, D+3) packed random draws
    wmat = wmat_ref[...]                  # (_W_ROWS, _WPAD) packed weight matrices
    vmat = vmat_ref[...]                  # (_V_ROWS, _WPAD) packed bias/LN vectors

    eps = rnd[:, 0:D]                     # N(0,1) noise
    u1 = rnd[:, D:D + 1]                  # U[0,1) for row (source) sampling
    u2 = rnd[:, D + 1:D + 2]              # U[0,1) for column (target) sampling
    t = rnd[:, D + 2:D + 3]               # U[0,1) flow time

    # Small helper index matrices (B x B).
    row_i = lax.broadcasted_iota(jnp.int32, (B, B), 0)
    col_i = lax.broadcasted_iota(jnp.int32, (B, B), 1)
    le = (row_i <= col_i).astype(f32)     # le[k, j] = 1 iff k <= j (cumsum operator)
    eye = (row_i == col_i).astype(f32)

    # ------------------ OT plan (entropic Sinkhorn approximation) --------------
    # Squared-euclidean cost via the matmul identity; the inner-product term runs
    # on the MXU, the squared norms are cheap keepdims reductions.  ||x1||^2 is
    # re-oriented onto the lane axis with a mask-mul-reduce (no transpose needed).
    g01 = lax.dot_general(src, tgt, (((1,), (1,)), ((), ())),
                          preferred_element_type=f32)            # (B,B)  <x0_i, x1_j>
    sq0 = jnp.sum(src * src, axis=1, keepdims=True)              # (B,1)
    sq1 = jnp.sum(tgt * tgt, axis=1, keepdims=True)              # (B,1)
    sq1_lane = jnp.sum(sq1 * eye, axis=0, keepdims=True)         # (1,B)
    cost = sq0 + sq1_lane - 2.0 * g01                            # (B,B) >= 0

    # Scale-adaptive epsilon (see module TODO): exp argument stays in [-1/reg, 0],
    # so K never underflows regardless of batch size / cost spread.
    cmax = jnp.max(jnp.max(cost, axis=1, keepdims=True), axis=0, keepdims=True)
    kmat = jnp.exp(-cost * pl.reciprocal(SINKHORN_REG * cmax + 1e-12, approx=False))

    a = 1.0 / B                                                  # uniform marginals
    u = jnp.full((B, 1), a, f32)                                 # sublane-oriented
    v = jnp.full((1, B), a, f32)                                 # lane-oriented

    # Sinkhorn matvecs as broadcast-mul + axis reductions:
    #   K v   -> lane reduction   (v lives on the lane axis)
    #   K^T u -> sublane reduction (u lives on the sublane axis)
    # so there is NO K transpose and NO MXU push/pop latency anywhere on the
    # serial critical path.  Divides go to the EUP via approx reciprocal.
    def sinkhorn_step(_, carry):
        uu, vv = carry
        for _r in range(SINK_UNROLL):                            # static unroll
            kv = jnp.sum(kmat * vv, axis=1, keepdims=True)       # (B,1)  K v
            uu = a * pl.reciprocal(kv + 1e-30, approx=True)
            ktu = jnp.sum(kmat * uu, axis=0, keepdims=True)      # (1,B)  K^T u
            vv = a * pl.reciprocal(ktu + 1e-30, approx=True)
        return uu, vv

    u, v = lax.fori_loop(0, SINKHORN_ITERS // SINK_UNROLL, sinkhorn_step, (u, v))

    # Fused plan finalization: plan[i, j] = u_i * K[i, j] * v_j (never leaves VMEM).
    plan = u * kmat * v                                          # (B,B)

    # ------------- sample coupled pairs (x0, x1) from the plan -----------------
    # Two-stage inverse-CDF sampling of the joint (equivalent to a categorical over
    # the flattened plan): row i ~ row-marginal, then j ~ plan[i, :] / mass_i.
    r = jnp.sum(plan, axis=1, keepdims=True)                     # (B,1) row masses
    total = jnp.sum(r, axis=0, keepdims=True)                    # (1,1)
    cdf_r = jnp.sum(r * le, axis=0, keepdims=True)               # (1,B) cumulative rows
    i_cnt = jnp.sum((cdf_r <= u1 * total).astype(f32), axis=1, keepdims=True)
    i_idx = jnp.minimum(i_cnt, float(B - 1)).astype(jnp.int32)   # (B,1)
    onehot_i = (col_i == i_idx).astype(f32)                      # (B,B)

    x0 = jnp.dot(onehot_i, src, preferred_element_type=f32)      # gather via MXU
    row_sel = jnp.dot(onehot_i, plan, preferred_element_type=f32)  # plan[i_b, :]
    ccdf = jnp.dot(row_sel, le, preferred_element_type=f32)      # per-row cumsum
    mass = jnp.sum(row_sel, axis=1, keepdims=True)               # (B,1)
    j_cnt = jnp.sum((ccdf <= u2 * mass).astype(f32), axis=1, keepdims=True)
    j_idx = jnp.minimum(j_cnt, float(B - 1)).astype(jnp.int32)
    onehot_j = (col_i == j_idx).astype(f32)
    x1 = jnp.dot(onehot_j, tgt, preferred_element_type=f32)      # gather via MXU

    # --------------------------- CFM sample ------------------------------------
    xt = t * x1 + (1.0 - t) * x0 + SIGMA * eps
    ut = x1 - x0

    # ----------------- time encoder + velocity net -----------------------------
    d_out0 = NET_DIMS[1]
    if USE_TIME_EMB:
        E = TIME_EMBED_DIM
        tw1 = vmat[0:1, 0:E]
        tb1 = vmat[1:2, 0:E]
        tg1 = vmat[2:3, 0:E]
        tbt1 = vmat[3:4, 0:E]
        tb2 = vmat[4:5, 0:D]
        # Linear(1, E) is an outer product t * w_row + b.
        h_t = _gelu(_layer_norm(t * tw1 + tb1, tg1, tbt1))
        t_emb = jnp.dot(h_t, wmat[0:E, 0:D], preferred_element_type=f32) + tb2

    # First Linear: h = concat([xt, ut, t_emb]) @ W0 + b0, written as a sum of
    # row-block matmuls to avoid a lane-axis concatenate (mathematically identical).
    w0 = wmat[_W_OFFS[0]:_W_OFFS[0] + NET_DIMS[0], 0:d_out0]
    h = (jnp.dot(xt, w0[0:D], preferred_element_type=f32)
         + jnp.dot(ut, w0[D:2 * D], preferred_element_type=f32))
    if USE_TIME_EMB:
        h = h + jnp.dot(t_emb, w0[2 * D:3 * D], preferred_element_type=f32)
    h = h + vmat[_V_NET0:_V_NET0 + 1, 0:d_out0]
    h = _gelu(_layer_norm(h,
                          vmat[_V_NET0 + 1:_V_NET0 + 2, 0:d_out0],
                          vmat[_V_NET0 + 2:_V_NET0 + 3, 0:d_out0]))
    # Dropout(p=0.0) == Identity in this (eval-mode) synthetic config.

    n_lin = len(NET_DIMS) - 1
    for li in range(1, n_lin):
        d_in, d_out = NET_DIMS[li], NET_DIMS[li + 1]
        w = wmat[_W_OFFS[li]:_W_OFFS[li] + d_in, 0:d_out]
        rv = _V_NET0 + 3 * li
        h = jnp.dot(h, w, preferred_element_type=f32) + vmat[rv:rv + 1, 0:d_out]
        h = _layer_norm(h, vmat[rv + 1:rv + 2, 0:d_out], vmat[rv + 2:rv + 3, 0:d_out])
        h = _gelu(h) if li < n_lin - 1 else jnp.tanh(h)          # last layer: Tanh

    # Single merged output slab: [v | xt].
    out_ref[:, 0:D] = h
    out_ref[:, D:2 * D] = xt


# ------------------------------- wrapper ---------------------------------------
def exact_ot_flow_forward(params, source, target, key):
    b, d = source.shape
    k1, k2, kt, ke = jax.random.split(key, 4)
    eps = jax.random.normal(ke, (b, d), jnp.float32)
    u1 = jax.random.uniform(k1, (b, 1), jnp.float32)
    u2 = jax.random.uniform(k2, (b, 1), jnp.float32)
    t = jax.random.uniform(kt, (b, 1), jnp.float32)
    rnd = jnp.concatenate([eps, u1, u2, t], axis=1)              # (B, D+3)

    # Grid-less pallas_call: whole arrays land in VMEM, no 1-step pipeline overhead.
    # NOTE(v7x): if BATCH ever grows beyond a single tile, add a leading batch-tile
    # grid axis with dimension_semantics=("parallel",) to shard across both TCs.
    out = pl.pallas_call(
        _fused_kernel,
        out_shape=jax.ShapeDtypeStruct((b, 2 * d), jnp.float32),
    )(source, target, rnd, params["wmat"], params["vmat"])

    v = out[:, :d]
    xt = out[:, d:]
    return v, xt, t[:, 0]


# ------------------------------ parameter init ---------------------------------
def _linear_init(key, fan_in, fan_out):
    kw, kb = jax.random.split(key)
    bound = 1.0 / (fan_in ** 0.5)
    w = jax.random.uniform(kw, (fan_in, fan_out), jnp.float32, -bound, bound)
    b = jax.random.uniform(kb, (1, fan_out), jnp.float32, -bound, bound)
    return w, b


def _pad_lanes(x, width=_WPAD):
    return jnp.pad(x, ((0, 0), (0, width - x.shape[1])))


def init_params(key):
    """Params are packed at init time into two lane-dense slabs:
       wmat: all weight matrices stacked along sublanes (padded to width _WPAD)
       vmat: all bias / LayerNorm row vectors stacked along sublanes."""
    n_lin = len(NET_DIMS) - 1
    keys = jax.random.split(key, 2 + n_lin)

    w_blocks, v_rows = [], []
    if USE_TIME_EMB:
        tw1, tb1 = _linear_init(keys[0], 1, TIME_EMBED_DIM)
        tw2, tb2 = _linear_init(keys[1], TIME_EMBED_DIM, LATENT_DIM)
        v_rows += [tw1, tb1,
                   jnp.ones((1, TIME_EMBED_DIM), jnp.float32),
                   jnp.zeros((1, TIME_EMBED_DIM), jnp.float32),
                   tb2]
        w_blocks.append(tw2)
    for i in range(n_lin):
        w, b = _linear_init(keys[2 + i], NET_DIMS[i], NET_DIMS[i + 1])
        w_blocks.append(w)
        v_rows += [b,
                   jnp.ones((1, NET_DIMS[i + 1]), jnp.float32),
                   jnp.zeros((1, NET_DIMS[i + 1]), jnp.float32)]

    wmat = jnp.concatenate([_pad_lanes(w) for w in w_blocks], axis=0)
    vmat = jnp.concatenate([_pad_lanes(r) for r in v_rows], axis=0)
    assert wmat.shape == (_W_ROWS, _WPAD)
    assert vmat.shape == (_V_ROWS, _WPAD)
    return {"wmat": wmat, "vmat": vmat}


# ----------------------------------- main ---------------------------------------
if __name__ == "__main__":
    root = jax.random.PRNGKey(0)
    k_src, k_tgt, k_par, k_fwd = jax.random.split(root, 4)

    source = jax.random.normal(k_src, (BATCH, LATENT_DIM), jnp.float32)
    target = jax.random.normal(k_tgt, (BATCH, LATENT_DIM), jnp.float32) + 1.0
    params = init_params(k_par)

    fwd = jax.jit(exact_ot_flow_forward)
    v, xt, t = jax.block_until_ready(fwd(params, source, target, k_fwd))

    assert v.shape == (BATCH, LATENT_DIM)
    assert xt.shape == (BATCH, LATENT_DIM)
    assert t.shape == (BATCH,)
    assert bool(jnp.all(jnp.isfinite(v))) and bool(jnp.all(jnp.isfinite(xt)))
    assert bool(jnp.all(jnp.abs(v) <= 1.0 + 1e-5))   # final Tanh bound
    assert bool(jnp.all((t >= 0.0) & (t < 1.0)))

    print("KERNEL_OK")
</pallas_src>

<mosaic_0001>
module attributes {stable_mosaic.version = 11 : i64} {
  func.func @_fused_kernel(%arg0: memref<8x16xf32, #tpu.memory_space<vmem>>, %arg1: memref<8x16xf32, #tpu.memory_space<vmem>>, %arg2: memref<8x19xf32, #tpu.memory_space<vmem>>, %arg3: memref<128x32xf32, #tpu.memory_space<vmem>>, %arg4: memref<14x32xf32, #tpu.memory_space<vmem>>, %arg5: memref<8x32xf32, #tpu.memory_space<vmem>>) attributes {dimension_semantics = [], scalar_prefetch = 0 : i64, scratch_operands = 0 : i64, tpu.core_type = #tpu.core_type<tc>} {
    %c0 = arith.constant 0 : index
    %c0_0 = arith.constant 0 : index
    %0 = vector.load %arg0[%c0, %c0_0] : memref<8x16xf32, #tpu.memory_space<vmem>>, vector<8x16xf32>
    %c0_1 = arith.constant 0 : index
    %c0_2 = arith.constant 0 : index
    %1 = vector.load %arg1[%c0_1, %c0_2] : memref<8x16xf32, #tpu.memory_space<vmem>>, vector<8x16xf32>
    %c0_3 = arith.constant 0 : index
    %c0_4 = arith.constant 0 : index
    %2 = vector.load %arg2[%c0_3, %c0_4] : memref<8x19xf32, #tpu.memory_space<vmem>>, vector<8x19xf32>
    %c0_5 = arith.constant 0 : index
    %c0_6 = arith.constant 0 : index
    %3 = vector.load %arg3[%c0_5, %c0_6] : memref<128x32xf32, #tpu.memory_space<vmem>>, vector<128x32xf32>
    %c0_7 = arith.constant 0 : index
    %c0_8 = arith.constant 0 : index
    %4 = vector.load %arg4[%c0_7, %c0_8] : memref<14x32xf32, #tpu.memory_space<vmem>>, vector<14x32xf32>
    %5 = vector.extract_strided_slice %2 {offsets = [0, 0], sizes = [8, 16], strides = [1, 1]} : vector<8x19xf32> to vector<8x16xf32>
    %6 = vector.extract_strided_slice %2 {offsets = [0, 16], sizes = [8, 1], strides = [1, 1]} : vector<8x19xf32> to vector<8x1xf32>
    %7 = vector.extract_strided_slice %2 {offsets = [0, 17], sizes = [8, 1], strides = [1, 1]} : vector<8x19xf32> to vector<8x1xf32>
    %8 = vector.extract_strided_slice %2 {offsets = [0, 18], sizes = [8, 1], strides = [1, 1]} : vector<8x19xf32> to vector<8x1xf32>
    %9 = tpu.iota {dimensions = array<i32: 0>} : vector<8x8xi32>
    %10 = tpu.iota {dimensions = array<i32: 1>} : vector<8x8xi32>
    %11 = arith.cmpi sle, %9, %10 : vector<8x8xi32>
    %12 = arith.extui %11 : vector<8x8xi1> to vector<8x8xi32>
    %13 = arith.sitofp %12 : vector<8x8xi32> to vector<8x8xf32>
    %14 = arith.cmpi eq, %9, %10 : vector<8x8xi32>
    %15 = arith.extui %14 : vector<8x8xi1> to vector<8x8xi32>
    %16 = arith.sitofp %15 : vector<8x8xi32> to vector<8x8xf32>
    %cst = arith.constant dense<0.000000e+00> : vector<8x8xf32>
    %17 = tpu.matmul %0, %1, %cst {dimension_numbers = #tpu.dot_dimension_numbers<[1], [1], [0], [0], [0, 0, 1, 0], [], []>} : vector<8x16xf32>, vector<8x16xf32>, vector<8x8xf32> -> vector<8x8xf32>
    %18 = arith.mulf %0, %0 : vector<8x16xf32>
    %cst_9 = arith.constant dense<0.000000e+00> : vector<8xf32>
    %19 = vector.multi_reduction <add>, %18, %cst_9 [1] : vector<8x16xf32> to vector<8xf32>
    %20 = vector.shape_cast %19 : vector<8xf32> to vector<8x1xf32>
    %21 = arith.mulf %1, %1 : vector<8x16xf32>
    %cst_10 = arith.constant dense<0.000000e+00> : vector<8xf32>
    %22 = vector.multi_reduction <add>, %21, %cst_10 [1] : vector<8x16xf32> to vector<8xf32>
    %23 = vector.shape_cast %22 : vector<8xf32> to vector<8x1xf32>
    %24 = vector.broadcast %23 : vector<8x1xf32> to vector<8x8xf32>
    %25 = arith.mulf %24, %16 : vector<8x8xf32>
    %cst_11 = arith.constant dense<0.000000e+00> : vector<8xf32>
    %26 = vector.multi_reduction <add>, %25, %cst_11 [0] : vector<8x8xf32> to vector<8xf32>
    %27 = vector.shape_cast %26 : vector<8xf32> to vector<1x8xf32>
    %28 = vector.broadcast %20 : vector<8x1xf32> to vector<8x8xf32>
    %29 = vector.broadcast %27 : vector<1x8xf32> to vector<8x8xf32>
    %30 = arith.addf %28, %29 : vector<8x8xf32>
    %cst_12 = arith.constant 2.000000e+00 : f32
    %31 = vector.broadcast %cst_12 : f32 to vector<8x8xf32>
    %32 = arith.mulf %31, %17 : vector<8x8xf32>
    %33 = arith.subf %30, %32 : vector<8x8xf32>
    %cst_13 = arith.constant dense<0xFF800000> : vector<8xf32>
    %34 = vector.multi_reduction <maximumf>, %33, %cst_13 [1] : vector<8x8xf32> to vector<8xf32>
    %35 = vector.shape_cast %34 : vector<8xf32> to vector<8x1xf32>
    %cst_14 = arith.constant dense<0xFF800000> : vector<1xf32>
    %36 = vector.multi_reduction <maximumf>, %35, %cst_14 [0] : vector<8x1xf32> to vector<1xf32>
    %37 = vector.shape_cast %36 : vector<1xf32> to vector<1x1xf32>
    %cst_15 = arith.constant 0.000000e+00 : f32
    %38 = vector.broadcast %cst_15 : f32 to vector<8x8xf32>
    %39 = arith.subf %38, %33 : vector<8x8xf32>
    %cst_16 = arith.constant 5.000000e-02 : f32
    %40 = vector.broadcast %cst_16 : f32 to vector<1x1xf32>
    %41 = arith.mulf %40, %37 : vector<1x1xf32>
    %cst_17 = arith.constant 9.99999996E-13 : f32
    %42 = vector.broadcast %cst_17 : f32 to vector<1x1xf32>
    %43 = arith.addf %41, %42 : vector<1x1xf32>
    %44 = tpu.reciprocal %43 : vector<1x1xf32> -> vector<1x1xf32>
    %45 = vector.broadcast %44 : vector<1x1xf32> to vector<8x8xf32>
    %46 = arith.mulf %39, %45 : vector<8x8xf32>
    %47 = math.exp %46 : vector<8x8xf32>
    %cst_18 = arith.constant 1.250000e-01 : f32
    %48 = vector.broadcast %cst_18 : f32 to vector<8x1xf32>
    %cst_19 = arith.constant 1.250000e-01 : f32
    %49 = vector.broadcast %cst_19 : f32 to vector<1x8xf32>
    %c0_i32 = arith.constant 0 : i32
    %c20_i32 = arith.constant 20 : i32
    %50 = arith.addi %c0_i32, %c20_i32 : i32
    %c1_i32 = arith.constant 1 : i32
    %51:2 = scf.for %arg6 = %c0_i32 to %50 step %c1_i32 iter_args(%arg7 = %48, %arg8 = %49) -> (vector<8x1xf32>, vector<1x8xf32>)  : i32 {
      %359 = vector.broadcast %arg8 : vector<1x8xf32> to vector<8x8xf32>
      %360 = arith.mulf %47, %359 : vector<8x8xf32>
      %cst_111 = arith.constant dense<0.000000e+00> : vector<8xf32>
      %361 = vector.multi_reduction <add>, %360, %cst_111 [1] : vector<8x8xf32> to vector<8xf32>
      %362 = vector.shape_cast %361 : vector<8xf32> to vector<8x1xf32>
      %cst_112 = arith.constant 1.000000e-30 : f32
      %363 = vector.broadcast %cst_112 : f32 to vector<8x1xf32>
      %364 = arith.addf %362, %363 : vector<8x1xf32>
      %365 = tpu.reciprocal %364 {approx = true} : vector<8x1xf32> -> vector<8x1xf32>
      %cst_113 = arith.constant 1.250000e-01 : f32
      %366 = vector.broadcast %cst_113 : f32 to vector<8x1xf32>
      %367 = arith.mulf %366, %365 : vector<8x1xf32>
      %368 = vector.broadcast %367 : vector<8x1xf32> to vector<8x8xf32>
      %369 = arith.mulf %47, %368 : vector<8x8xf32>
      %cst_114 = arith.constant dense<0.000000e+00> : vector<8xf32>
      %370 = vector.multi_reduction <add>, %369, %cst_114 [0] : vector<8x8xf32> to vector<8xf32>
      %371 = vector.shape_cast %370 : vector<8xf32> to vector<1x8xf32>
      %cst_115 = arith.constant 1.000000e-30 : f32
      %372 = vector.broadcast %cst_115 : f32 to vector<1x8xf32>
      %373 = arith.addf %371, %372 : vector<1x8xf32>
      %374 = tpu.reciprocal %373 {approx = true} : vector<1x8xf32> -> vector<1x8xf32>
      %cst_116 = arith.constant 1.250000e-01 : f32
      %375 = vector.broadcast %cst_116 : f32 to vector<1x8xf32>
      %376 = arith.mulf %375, %374 : vector<1x8xf32>
      %377 = vector.broadcast %376 : vector<1x8xf32> to vector<8x8xf32>
      %378 = arith.mulf %47, %377 : vector<8x8xf32>
      %cst_117 = arith.constant dense<0.000000e+00> : vector<8xf32>
      %379 = vector.multi_reduction <add>, %378, %cst_117 [1] : vector<8x8xf32> to vector<8xf32>
      %380 = vector.shape_cast %379 : vector<8xf32> to vector<8x1xf32>
      %cst_118 = arith.constant 1.000000e-30 : f32
      %381 = vector.broadcast %cst_118 : f32 to vector<8x1xf32>
      %382 = arith.addf %380, %381 : vector<8x1xf32>
      %383 = tpu.reciprocal %382 {approx = true} : vector<8x1xf32> -> vector<8x1xf32>
      %cst_119 = arith.constant 1.250000e-01 : f32
      %384 = vector.broadcast %cst_119 : f32 to vector<8x1xf32>
      %385 = arith.mulf %384, %383 : vector<8x1xf32>
      %386 = vector.broadcast %385 : vector<8x1xf32> to vector<8x8xf32>
      %387 = arith.mulf %47, %386 : vector<8x8xf32>
      %cst_120 = arith.constant dense<0.000000e+00> : vector<8xf32>
      %388 = vector.multi_reduction <add>, %387, %cst_120 [0] : vector<8x8xf32> to vector<8xf32>
      %389 = vector.shape_cast %388 : vector<8xf32> to vector<1x8xf32>
      %cst_121 = arith.constant 1.000000e-30 : f32
      %390 = vector.broadcast %cst_121 : f32 to vector<1x8xf32>
      %391 = arith.addf %389, %390 : vector<1x8xf32>
      %392 = tpu.reciprocal %391 {approx = true} : vector<1x8xf32> -> vector<1x8xf32>
      %cst_122 = arith.constant 1.250000e-01 : f32
      %393 = vector.broadcast %cst_122 : f32 to vector<1x8xf32>
      %394 = arith.mulf %393, %392 : vector<1x8xf32>
      %395 = vector.broadcast %394 : vector<1x8xf32> to vector<8x8xf32>
      %396 = arith.mulf %47, %395 : vector<8x8xf32>
      %cst_123 = arith.constant dense<0.000000e+00> : vector<8xf32>
      %397 = vector.multi_reduction <add>, %396, %cst_123 [1] : vector<8x8xf32> to vector<8xf32>
      %398 = vector.shape_cast %397 : vector<8xf32> to vector<8x1xf32>
      %cst_124 = arith.constant 1.000000e-30 : f32
      %399 = vector.broadcast %cst_124 : f32 to vector<8x1xf32>
      %400 = arith.addf %398, %399 : vector<8x1xf32>
      %401 = tpu.reciprocal %400 {approx = true} : vector<8x1xf32> -> vector<8x1xf32>
      %cst_125 = arith.constant 1.250000e-01 : f32
      %402 = vector.broadcast %cst_125 : f32 to vector<8x1xf32>
      %403 = arith.mulf %402, %401 : vector<8x1xf32>
      %404 = vector.broadcast %403 : vector<8x1xf32> to vector<8x8xf32>
      %405 = arith.mulf %47, %404 : vector<8x8xf32>
      %cst_126 = arith.constant dense<0.000000e+00> : vector<8xf32>
      %406 = vector.multi_reduction <add>, %405, %cst_126 [0] : vector<8x8xf32> to vector<8xf32>
      %407 = vector.shape_cast %406 : vector<8xf32> to vector<1x8xf32>
      %cst_127 = arith.constant 1.000000e-30 : f32
      %408 = vector.broadcast %cst_127 : f32 to vector<1x8xf32>
      %409 = arith.addf %407, %408 : vector<1x8xf32>
      %410 = tpu.reciprocal %409 {approx = true} : vector<1x8xf32> -> vector<1x8xf32>
      %cst_128 = arith.constant 1.250000e-01 : f32
      %411 = vector.broadcast %cst_128 : f32 to vector<1x8xf32>
      %412 = arith.mulf %411, %410 : vector<1x8xf32>
      %413 = vector.broadcast %412 : vector<1x8xf32> to vector<8x8xf32>
      %414 = arith.mulf %47, %413 : vector<8x8xf32>
      %cst_129 = arith.constant dense<0.000000e+00> : vector<8xf32>
      %415 = vector.multi_reduction <add>, %414, %cst_129 [1] : vector<8x8xf32> to vector<8xf32>
      %416 = vector.shape_cast %415 : vector<8xf32> to vector<8x1xf32>
      %cst_130 = arith.constant 1.000000e-30 : f32
      %417 = vector.broadcast %cst_130 : f32 to vector<8x1xf32>
      %418 = arith.addf %416, %417 : vector<8x1xf32>
      %419 = tpu.reciprocal %418 {approx = true} : vector<8x1xf32> -> vector<8x1xf32>
      %cst_131 = arith.constant 1.250000e-01 : f32
      %420 = vector.broadcast %cst_131 : f32 to vector<8x1xf32>
      %421 = arith.mulf %420, %419 : vector<8x1xf32>
      %422 = vector.broadcast %421 : vector<8x1xf32> to vector<8x8xf32>
      %423 = arith.mulf %47, %422 : vector<8x8xf32>
      %cst_132 = arith.constant dense<0.000000e+00> : vector<8xf32>
      %424 = vector.multi_reduction <add>, %423, %cst_132 [0] : vector<8x8xf32> to vector<8xf32>
      %425 = vector.shape_cast %424 : vector<8xf32> to vector<1x8xf32>
      %cst_133 = arith.constant 1.000000e-30 : f32
      %426 = vector.broadcast %cst_133 : f32 to vector<1x8xf32>
      %427 = arith.addf %425, %426 : vector<1x8xf32>
      %428 = tpu.reciprocal %427 {approx = true} : vector<1x8xf32> -> vector<1x8xf32>
      %cst_134 = arith.constant 1.250000e-01 : f32
      %429 = vector.broadcast %cst_134 : f32 to vector<1x8xf32>
      %430 = arith.mulf %429, %428 : vector<1x8xf32>
      %431 = vector.broadcast %430 : vector<1x8xf32> to vector<8x8xf32>
      %432 = arith.mulf %47, %431 : vector<8x8xf32>
      %cst_135 = arith.constant dense<0.000000e+00> : vector<8xf32>
      %433 = vector.multi_reduction <add>, %432, %cst_135 [1] : vector<8x8xf32> to vector<8xf32>
      %434 = vector.shape_cast %433 : vector<8xf32> to vector<8x1xf32>
      %cst_136 = arith.constant 1.000000e-30 : f32
      %435 = vector.broadcast %cst_136 : f32 to vector<8x1xf32>
      %436 = arith.addf %434, %435 : vector<8x1xf32>
      %437 = tpu.reciprocal %436 {approx = true} : vector<8x1xf32> -> vector<8x1xf32>
      %cst_137 = arith.constant 1.250000e-01 : f32
      %438 = vector.broadcast %cst_137 : f32 to vector<8x1xf32>
      %439 = arith.mulf %438, %437 : vector<8x1xf32>
      %440 = vector.broadcast %439 : vector<8x1xf32> to vector<8x8xf32>
      %441 = arith.mulf %47, %440 : vector<8x8xf32>
      %cst_138 = arith.constant dense<0.000000e+00> : vector<8xf32>
      %442 = vector.multi_reduction <add>, %441, %cst_138 [0] : vector<8x8xf32> to vector<8xf32>
      %443 = vector.shape_cast %442 : vector<8xf32> to vector<1x8xf32>
      %cst_139 = arith.constant 1.000000e-30 : f32
      %444 = vector.broadcast %cst_139 : f32 to vector<1x8xf32>
      %445 = arith.addf %443, %444 : vector<1x8xf32>
      %446 = tpu.reciprocal %445 {approx = true} : vector<1x8xf32> -> vector<1x8xf32>
      %cst_140 = arith.constant 1.250000e-01 : f32
      %447 = vector.broadcast %cst_140 : f32 to vector<1x8xf32>
      %448 = arith.mulf %447, %446 : vector<1x8xf32>
      scf.yield %439, %448 : vector<8x1xf32>, vector<1x8xf32>
    }
    %52 = vector.broadcast %51#0 : vector<8x1xf32> to vector<8x8xf32>
    %53 = arith.mulf %52, %47 : vector<8x8xf32>
    %54 = vector.broadcast %51#1 : vector<1x8xf32> to vector<8x8xf32>
    %55 = arith.mulf %53, %54 : vector<8x8xf32>
    %cst_20 = arith.constant dense<0.000000e+00> : vector<8xf32>
    %56 = vector.multi_reduction <add>, %55, %cst_20 [1] : vector<8x8xf32> to vector<8xf32>
    %57 = vector.shape_cast %56 : vector<8xf32> to vector<8x1xf32>
    %cst_21 = arith.constant dense<0.000000e+00> : vector<1xf32>
    %58 = vector.multi_reduction <add>, %57, %cst_21 [0] : vector<8x1xf32> to vector<1xf32>
    %59 = vector.shape_cast %58 : vector<1xf32> to vector<1x1xf32>
    %60 = vector.broadcast %57 : vector<8x1xf32> to vector<8x8xf32>
    %61 = arith.mulf %60, %13 : vector<8x8xf32>
    %cst_22 = arith.constant dense<0.000000e+00> : vector<8xf32>
    %62 = vector.multi_reduction <add>, %61, %cst_22 [0] : vector<8x8xf32> to vector<8xf32>
    %63 = vector.shape_cast %62 : vector<8xf32> to vector<1x8xf32>
    %64 = vector.broadcast %59 : vector<1x1xf32> to vector<8x1xf32>
    %65 = arith.mulf %6, %64 : vector<8x1xf32>
    %66 = vector.broadcast %63 : vector<1x8xf32> to vector<8x8xf32>
    %67 = vector.broadcast %65 : vector<8x1xf32> to vector<8x8xf32>
    %68 = arith.cmpf ole, %66, %67 : vector<8x8xf32>
    %69 = arith.extui %68 : vector<8x8xi1> to vector<8x8xi32>
    %70 = arith.sitofp %69 : vector<8x8xi32> to vector<8x8xf32>
    %cst_23 = arith.constant dense<0.000000e+00> : vector<8xf32>
    %71 = vector.multi_reduction <add>, %70, %cst_23 [1] : vector<8x8xf32> to vector<8xf32>
    %72 = vector.shape_cast %71 : vector<8xf32> to vector<8x1xf32>
    %cst_24 = arith.constant 7.000000e+00 : f32
    %73 = vector.broadcast %cst_24 : f32 to vector<8x1xf32>
    %74 = arith.minimumf %72, %73 : vector<8x1xf32>
    %75 = arith.fptosi %74 : vector<8x1xf32> to vector<8x1xi32>
    %76 = vector.broadcast %75 : vector<8x1xi32> to vector<8x8xi32>
    %77 = arith.cmpi eq, %10, %76 : vector<8x8xi32>
    %78 = arith.extui %77 : vector<8x8xi1> to vector<8x8xi32>
    %79 = arith.sitofp %78 : vector<8x8xi32> to vector<8x8xf32>
    %cst_25 = arith.constant dense<0.000000e+00> : vector<8x16xf32>
    %80 = tpu.matmul %79, %0, %cst_25 {dimension_numbers = #tpu.dot_dimension_numbers<[1], [0], [0], [1], [0, 0, 1, 1], [], []>} : vector<8x8xf32>, vector<8x16xf32>, vector<8x16xf32> -> vector<8x16xf32>
    %cst_26 = arith.constant dense<0.000000e+00> : vector<8x8xf32>
    %81 = tpu.matmul %79, %55, %cst_26 {dimension_numbers = #tpu.dot_dimension_numbers<[1], [0], [0], [1], [0, 0, 1, 1], [], []>} : vector<8x8xf32>, vector<8x8xf32>, vector<8x8xf32> -> vector<8x8xf32>
    %cst_27 = arith.constant dense<0.000000e+00> : vector<8x8xf32>
    %82 = tpu.matmul %81, %13, %cst_27 {dimension_numbers = #tpu.dot_dimension_numbers<[1], [0], [0], [1], [0, 0, 1, 1], [], []>} : vector<8x8xf32>, vector<8x8xf32>, vector<8x8xf32> -> vector<8x8xf32>
    %cst_28 = arith.constant dense<0.000000e+00> : vector<8xf32>
    %83 = vector.multi_reduction <add>, %81, %cst_28 [1] : vector<8x8xf32> to vector<8xf32>
    %84 = vector.shape_cast %83 : vector<8xf32> to vector<8x1xf32>
    %85 = arith.mulf %7, %84 : vector<8x1xf32>
    %86 = vector.broadcast %85 : vector<8x1xf32> to vector<8x8xf32>
    %87 = arith.cmpf ole, %82, %86 : vector<8x8xf32>
    %88 = arith.extui %87 : vector<8x8xi1> to vector<8x8xi32>
    %89 = arith.sitofp %88 : vector<8x8xi32> to vector<8x8xf32>
    %cst_29 = arith.constant dense<0.000000e+00> : vector<8xf32>
    %90 = vector.multi_reduction <add>, %89, %cst_29 [1] : vector<8x8xf32> to vector<8xf32>
    %91 = vector.shape_cast %90 : vector<8xf32> to vector<8x1xf32>
    %cst_30 = arith.constant 7.000000e+00 : f32
    %92 = vector.broadcast %cst_30 : f32 to vector<8x1xf32>
    %93 = arith.minimumf %91, %92 : vector<8x1xf32>
    %94 = arith.fptosi %93 : vector<8x1xf32> to vector<8x1xi32>
    %95 = vector.broadcast %94 : vector<8x1xi32> to vector<8x8xi32>
    %96 = arith.cmpi eq, %10, %95 : vector<8x8xi32>
    %97 = arith.extui %96 : vector<8x8xi1> to vector<8x8xi32>
    %98 = arith.sitofp %97 : vector<8x8xi32> to vector<8x8xf32>
    %cst_31 = arith.constant dense<0.000000e+00> : vector<8x16xf32>
    %99 = tpu.matmul %98, %1, %cst_31 {dimension_numbers = #tpu.dot_dimension_numbers<[1], [0], [0], [1], [0, 0, 1, 1], [], []>} : vector<8x8xf32>, vector<8x16xf32>, vector<8x16xf32> -> vector<8x16xf32>
    %100 = vector.broadcast %8 : vector<8x1xf32> to vector<8x16xf32>
    %101 = arith.mulf %100, %99 : vector<8x16xf32>
    %cst_32 = arith.constant 1.000000e+00 : f32
    %102 = vector.broadcast %cst_32 : f32 to vector<8x1xf32>
    %103 = arith.subf %102, %8 : vector<8x1xf32>
    %104 = vector.broadcast %103 : vector<8x1xf32> to vector<8x16xf32>
    %105 = arith.mulf %104, %80 : vector<8x16xf32>
    %106 = arith.addf %101, %105 : vector<8x16xf32>
    %cst_33 = arith.constant 1.000000e-01 : f32
    %107 = vector.broadcast %cst_33 : f32 to vector<8x16xf32>
    %108 = arith.mulf %107, %5 : vector<8x16xf32>
    %109 = arith.addf %106, %108 : vector<8x16xf32>
    %110 = arith.subf %99, %80 : vector<8x16xf32>
    %111 = vector.extract_strided_slice %4 {offsets = [0, 0], sizes = [1, 16], strides = [1, 1]} : vector<14x32xf32> to vector<1x16xf32>
    %112 = vector.extract_strided_slice %4 {offsets = [1, 0], sizes = [1, 16], strides = [1, 1]} : vector<14x32xf32> to vector<1x16xf32>
    %113 = vector.extract_strided_slice %4 {offsets = [2, 0], sizes = [1, 16], strides = [1, 1]} : vector<14x32xf32> to vector<1x16xf32>
    %114 = vector.extract_strided_slice %4 {offsets = [3, 0], sizes = [1, 16], strides = [1, 1]} : vector<14x32xf32> to vector<1x16xf32>
    %115 = vector.extract_strided_slice %4 {offsets = [4, 0], sizes = [1, 16], strides = [1, 1]} : vector<14x32xf32> to vector<1x16xf32>
    %116 = vector.broadcast %8 : vector<8x1xf32> to vector<8x16xf32>
    %117 = vector.broadcast %111 : vector<1x16xf32> to vector<8x16xf32>
    %118 = arith.mulf %116, %117 : vector<8x16xf32>
    %119 = vector.broadcast %112 : vector<1x16xf32> to vector<8x16xf32>
    %120 = arith.addf %118, %119 : vector<8x16xf32>
    %cst_34 = arith.constant dense<0.000000e+00> : vector<8xf32>
    %121 = vector.multi_reduction <add>, %120, %cst_34 [1] : vector<8x16xf32> to vector<8xf32>
    %122 = vector.shape_cast %121 : vector<8xf32> to vector<8x1xf32>
    %cst_35 = arith.constant 1.600000e+01 : f32
    %123 = vector.broadcast %cst_35 : f32 to vector<8x1xf32>
    %124 = arith.divf %122, %123 : vector<8x1xf32>
    %125 = vector.broadcast %124 : vector<8x1xf32> to vector<8x16xf32>
    %126 = arith.subf %120, %125 : vector<8x16xf32>
    %127 = arith.mulf %126, %126 : vector<8x16xf32>
    %cst_36 = arith.constant dense<0.000000e+00> : vector<8xf32>
    %128 = vector.multi_reduction <add>, %127, %cst_36 [1] : vector<8x16xf32> to vector<8xf32>
    %129 = vector.shape_cast %128 : vector<8xf32> to vector<8x1xf32>
    %cst_37 = arith.constant 1.600000e+01 : f32
    %130 = vector.broadcast %cst_37 : f32 to vector<8x1xf32>
    %131 = arith.divf %129, %130 : vector<8x1xf32>
    %cst_38 = arith.constant 9.99999974E-6 : f32
    %132 = vector.broadcast %cst_38 : f32 to vector<8x1xf32>
    %133 = arith.addf %131, %132 : vector<8x1xf32>
    %134 = math.rsqrt %133 : vector<8x1xf32>
    %135 = vector.broadcast %134 : vector<8x1xf32> to vector<8x16xf32>
    %136 = arith.mulf %126, %135 : vector<8x16xf32>
    %137 = vector.broadcast %113 : vector<1x16xf32> to vector<8x16xf32>
    %138 = arith.mulf %136, %137 : vector<8x16xf32>
    %139 = vector.broadcast %114 : vector<1x16xf32> to vector<8x16xf32>
    %140 = arith.addf %138, %139 : vector<8x16xf32>
    %cst_39 = arith.constant 5.000000e-01 : f32
    %141 = vector.broadcast %cst_39 : f32 to vector<8x16xf32>
    %142 = arith.mulf %141, %140 : vector<8x16xf32>
    %cst_40 = arith.constant 0.707106769 : f32
    %143 = vector.broadcast %cst_40 : f32 to vector<8x16xf32>
    %144 = arith.mulf %140, %143 : vector<8x16xf32>
    %cst_41 = arith.constant 0.000000e+00 : f32
    %145 = vector.broadcast %cst_41 : f32 to vector<8x16xf32>
    %146 = arith.cmpf oge, %144, %145 : vector<8x16xf32>
    %cst_42 = arith.constant 1.000000e+00 : f32
    %cst_43 = arith.constant -1.000000e+00 : f32
    %147 = vector.broadcast %cst_42 : f32 to vector<8x16xf32>
    %148 = vector.broadcast %cst_43 : f32 to vector<8x16xf32>
    %149 = arith.select %146, %147, %148 : vector<8x16xi1>, vector<8x16xf32>
    %150 = math.absf %144 : vector<8x16xf32>
    %cst_44 = arith.constant 0.327591091 : f32
    %151 = vector.broadcast %cst_44 : f32 to vector<8x16xf32>
    %152 = arith.mulf %151, %150 : vector<8x16xf32>
    %cst_45 = arith.constant 1.000000e+00 : f32
    %153 = vector.broadcast %cst_45 : f32 to vector<8x16xf32>
    %154 = arith.addf %153, %152 : vector<8x16xf32>
    %cst_46 = arith.constant 1.000000e+00 : f32
    %155 = vector.broadcast %cst_46 : f32 to vector<8x16xf32>
    %156 = arith.divf %155, %154 : vector<8x16xf32>
    %cst_47 = arith.constant 1.06140542 : f32
    %157 = vector.broadcast %cst_47 : f32 to vector<8x16xf32>
    %158 = arith.mulf %156, %157 : vector<8x16xf32>
    %cst_48 = arith.constant -1.45315206 : f32
    %159 = vector.broadcast %cst_48 : f32 to vector<8x16xf32>
    %160 = arith.addf %159, %158 : vector<8x16xf32>
    %161 = arith.mulf %156, %160 : vector<8x16xf32>
    %cst_49 = arith.constant 1.42141378 : f32
    %162 = vector.broadcast %cst_49 : f32 to vector<8x16xf32>
    %163 = arith.addf %162, %161 : vector<8x16xf32>
    %164 = arith.mulf %156, %163 : vector<8x16xf32>
    %cst_50 = arith.constant -0.284496725 : f32
    %165 = vector.broadcast %cst_50 : f32 to vector<8x16xf32>
    %166 = arith.addf %165, %164 : vector<8x16xf32>
    %167 = arith.mulf %156, %166 : vector<8x16xf32>
    %cst_51 = arith.constant 0.254829586 : f32
    %168 = vector.broadcast %cst_51 : f32 to vector<8x16xf32>
    %169 = arith.addf %168, %167 : vector<8x16xf32>
    %170 = arith.mulf %156, %169 : vector<8x16xf32>
    %cst_52 = arith.constant 0.000000e+00 : f32
    %171 = vector.broadcast %cst_52 : f32 to vector<8x16xf32>
    %172 = arith.subf %171, %150 : vector<8x16xf32>
    %173 = arith.mulf %172, %150 : vector<8x16xf32>
    %174 = math.exp %173 : vector<8x16xf32>
    %175 = arith.mulf %170, %174 : vector<8x16xf32>
    %cst_53 = arith.constant 1.000000e+00 : f32
    %176 = vector.broadcast %cst_53 : f32 to vector<8x16xf32>
    %177 = arith.subf %176, %175 : vector<8x16xf32>
    %178 = arith.mulf %149, %177 : vector<8x16xf32>
    %cst_54 = arith.constant 1.000000e+00 : f32
    %179 = vector.broadcast %cst_54 : f32 to vector<8x16xf32>
    %180 = arith.addf %179, %178 : vector<8x16xf32>
    %181 = arith.mulf %142, %180 : vector<8x16xf32>
    %182 = vector.extract_strided_slice %3 {offsets = [0, 0], sizes = [16, 16], strides = [1, 1]} : vector<128x32xf32> to vector<16x16xf32>
    %cst_55 = arith.constant dense<0.000000e+00> : vector<8x16xf32>
    %183 = tpu.matmul %181, %182, %cst_55 {dimension_numbers = #tpu.dot_dimension_numbers<[1], [0], [0], [1], [0, 0, 1, 1], [], []>} : vector<8x16xf32>, vector<16x16xf32>, vector<8x16xf32> -> vector<8x16xf32>
    %184 = vector.broadcast %115 : vector<1x16xf32> to vector<8x16xf32>
    %185 = arith.addf %183, %184 : vector<8x16xf32>
    %186 = vector.extract_strided_slice %3 {offsets = [16, 0], sizes = [48, 32], strides = [1, 1]} : vector<128x32xf32> to vector<48x32xf32>
    %187 = vector.extract_strided_slice %186 {offsets = [0, 0], sizes = [16, 32], strides = [1, 1]} : vector<48x32xf32> to vector<16x32xf32>
    %cst_56 = arith.constant dense<0.000000e+00> : vector<8x32xf32>
    %188 = tpu.matmul %109, %187, %cst_56 {dimension_numbers = #tpu.dot_dimension_numbers<[1], [0], [0], [1], [0, 0, 1, 1], [], []>} : vector<8x16xf32>, vector<16x32xf32>, vector<8x32xf32> -> vector<8x32xf32>
    %189 = vector.extract_strided_slice %186 {offsets = [16, 0], sizes = [16, 32], strides = [1, 1]} : vector<48x32xf32> to vector<16x32xf32>
    %cst_57 = arith.constant dense<0.000000e+00> : vector<8x32xf32>
    %190 = tpu.matmul %110, %189, %cst_57 {dimension_numbers = #tpu.dot_dimension_numbers<[1], [0], [0], [1], [0, 0, 1, 1], [], []>} : vector<8x16xf32>, vector<16x32xf32>, vector<8x32xf32> -> vector<8x32xf32>
    %191 = arith.addf %188, %190 : vector<8x32xf32>
    %192 = vector.extract_strided_slice %186 {offsets = [32, 0], sizes = [16, 32], strides = [1, 1]} : vector<48x32xf32> to vector<16x32xf32>
    %cst_58 = arith.constant dense<0.000000e+00> : vector<8x32xf32>
    %193 = tpu.matmul %185, %192, %cst_58 {dimension_numbers = #tpu.dot_dimension_numbers<[1], [0], [0], [1], [0, 0, 1, 1], [], []>} : vector<8x16xf32>, vector<16x32xf32>, vector<8x32xf32> -> vector<8x32xf32>
    %194 = arith.addf %191, %193 : vector<8x32xf32>
    %195 = vector.extract_strided_slice %4 {offsets = [5, 0], sizes = [1, 32], strides = [1, 1]} : vector<14x32xf32> to vector<1x32xf32>
    %196 = vector.broadcast %195 : vector<1x32xf32> to vector<8x32xf32>
    %197 = arith.addf %194, %196 : vector<8x32xf32>
    %198 = vector.extract_strided_slice %4 {offsets = [6, 0], sizes = [1, 32], strides = [1, 1]} : vector<14x32xf32> to vector<1x32xf32>
    %199 = vector.extract_strided_slice %4 {offsets = [7, 0], sizes = [1, 32], strides = [1, 1]} : vector<14x32xf32> to vector<1x32xf32>
    %cst_59 = arith.constant dense<0.000000e+00> : vector<8xf32>
    %200 = vector.multi_reduction <add>, %197, %cst_59 [1] : vector<8x32xf32> to vector<8xf32>
    %201 = vector.shape_cast %200 : vector<8xf32> to vector<8x1xf32>
    %cst_60 = arith.constant 3.200000e+01 : f32
    %202 = vector.broadcast %cst_60 : f32 to vector<8x1xf32>
    %203 = arith.divf %201, %202 : vector<8x1xf32>
    %204 = vector.broadcast %203 : vector<8x1xf32> to vector<8x32xf32>
    %205 = arith.subf %197, %204 : vector<8x32xf32>
    %206 = arith.mulf %205, %205 : vector<8x32xf32>
    %cst_61 = arith.constant dense<0.000000e+00> : vector<8xf32>
    %207 = vector.multi_reduction <add>, %206, %cst_61 [1] : vector<8x32xf32> to vector<8xf32>
    %208 = vector.shape_cast %207 : vector<8xf32> to vector<8x1xf32>
    %cst_62 = arith.constant 3.200000e+01 : f32
    %209 = vector.broadcast %cst_62 : f32 to vector<8x1xf32>
    %210 = arith.divf %208, %209 : vector<8x1xf32>
    %cst_63 = arith.constant 9.99999974E-6 : f32
    %211 = vector.broadcast %cst_63 : f32 to vector<8x1xf32>
    %212 = arith.addf %210, %211 : vector<8x1xf32>
    %213 = math.rsqrt %212 : vector<8x1xf32>
    %214 = vector.broadcast %213 : vector<8x1xf32> to vector<8x32xf32>
    %215 = arith.mulf %205, %214 : vector<8x32xf32>
    %216 = vector.broadcast %198 : vector<1x32xf32> to vector<8x32xf32>
    %217 = arith.mulf %215, %216 : vector<8x32xf32>
    %218 = vector.broadcast %199 : vector<1x32xf32> to vector<8x32xf32>
    %219 = arith.addf %217, %218 : vector<8x32xf32>
    %cst_64 = arith.constant 5.000000e-01 : f32
    %220 = vector.broadcast %cst_64 : f32 to vector<8x32xf32>
    %221 = arith.mulf %220, %219 : vector<8x32xf32>
    %cst_65 = arith.constant 0.707106769 : f32
    %222 = vector.broadcast %cst_65 : f32 to vector<8x32xf32>
    %223 = arith.mulf %219, %222 : vector<8x32xf32>
    %cst_66 = arith.constant 0.000000e+00 : f32
    %224 = vector.broadcast %cst_66 : f32 to vector<8x32xf32>
    %225 = arith.cmpf oge, %223, %224 : vector<8x32xf32>
    %cst_67 = arith.constant 1.000000e+00 : f32
    %cst_68 = arith.constant -1.000000e+00 : f32
    %226 = vector.broadcast %cst_67 : f32 to vector<8x32xf32>
    %227 = vector.broadcast %cst_68 : f32 to vector<8x32xf32>
    %228 = arith.select %225, %226, %227 : vector<8x32xi1>, vector<8x32xf32>
    %229 = math.absf %223 : vector<8x32xf32>
    %cst_69 = arith.constant 0.327591091 : f32
    %230 = vector.broadcast %cst_69 : f32 to vector<8x32xf32>
    %231 = arith.mulf %230, %229 : vector<8x32xf32>
    %cst_70 = arith.constant 1.000000e+00 : f32
    %232 = vector.broadcast %cst_70 : f32 to vector<8x32xf32>
    %233 = arith.addf %232, %231 : vector<8x32xf32>
    %cst_71 = arith.constant 1.000000e+00 : f32
    %234 = vector.broadcast %cst_71 : f32 to vector<8x32xf32>
    %235 = arith.divf %234, %233 : vector<8x32xf32>
    %cst_72 = arith.constant 1.06140542 : f32
    %236 = vector.broadcast %cst_72 : f32 to vector<8x32xf32>
    %237 = arith.mulf %235, %236 : vector<8x32xf32>
    %cst_73 = arith.constant -1.45315206 : f32
    %238 = vector.broadcast %cst_73 : f32 to vector<8x32xf32>
    %239 = arith.addf %238, %237 : vector<8x32xf32>
    %240 = arith.mulf %235, %239 : vector<8x32xf32>
    %cst_74 = arith.constant 1.42141378 : f32
    %241 = vector.broadcast %cst_74 : f32 to vector<8x32xf32>
    %242 = arith.addf %241, %240 : vector<8x32xf32>
    %243 = arith.mulf %235, %242 : vector<8x32xf32>
    %cst_75 = arith.constant -0.284496725 : f32
    %244 = vector.broadcast %cst_75 : f32 to vector<8x32xf32>
    %245 = arith.addf %244, %243 : vector<8x32xf32>
    %246 = arith.mulf %235, %245 : vector<8x32xf32>
    %cst_76 = arith.constant 0.254829586 : f32
    %247 = vector.broadcast %cst_76 : f32 to vector<8x32xf32>
    %248 = arith.addf %247, %246 : vector<8x32xf32>
    %249 = arith.mulf %235, %248 : vector<8x32xf32>
    %cst_77 = arith.constant 0.000000e+00 : f32
    %250 = vector.broadcast %cst_77 : f32 to vector<8x32xf32>
    %251 = arith.subf %250, %229 : vector<8x32xf32>
    %252 = arith.mulf %251, %229 : vector<8x32xf32>
    %253 = math.exp %252 : vector<8x32xf32>
    %254 = arith.mulf %249, %253 : vector<8x32xf32>
    %cst_78 = arith.constant 1.000000e+00 : f32
    %255 = vector.broadcast %cst_78 : f32 to vector<8x32xf32>
    %256 = arith.subf %255, %254 : vector<8x32xf32>
    %257 = arith.mulf %228, %256 : vector<8x32xf32>
    %cst_79 = arith.constant 1.000000e+00 : f32
    %258 = vector.broadcast %cst_79 : f32 to vector<8x32xf32>
    %259 = arith.addf %258, %257 : vector<8x32xf32>
    %260 = arith.mulf %221, %259 : vector<8x32xf32>
    %261 = vector.extract_strided_slice %3 {offsets = [64, 0], sizes = [32, 32], strides = [1, 1]} : vector<128x32xf32> to vector<32x32xf32>
    %cst_80 = arith.constant dense<0.000000e+00> : vector<8x32xf32>
    %262 = tpu.matmul %260, %261, %cst_80 {dimension_numbers = #tpu.dot_dimension_numbers<[1], [0], [0], [1], [0, 0, 1, 1], [], []>} : vector<8x32xf32>, vector<32x32xf32>, vector<8x32xf32> -> vector<8x32xf32>
    %263 = vector.extract_strided_slice %4 {offsets = [8, 0], sizes = [1, 32], strides = [1, 1]} : vector<14x32xf32> to vector<1x32xf32>
    %264 = vector.broadcast %263 : vector<1x32xf32> to vector<8x32xf32>
    %265 = arith.addf %262, %264 : vector<8x32xf32>
    %266 = vector.extract_strided_slice %4 {offsets = [9, 0], sizes = [1, 32], strides = [1, 1]} : vector<14x32xf32> to vector<1x32xf32>
    %267 = vector.extract_strided_slice %4 {offsets = [10, 0], sizes = [1, 32], strides = [1, 1]} : vector<14x32xf32> to vector<1x32xf32>
    %cst_81 = arith.constant dense<0.000000e+00> : vector<8xf32>
    %268 = vector.multi_reduction <add>, %265, %cst_81 [1] : vector<8x32xf32> to vector<8xf32>
    %269 = vector.shape_cast %268 : vector<8xf32> to vector<8x1xf32>
    %cst_82 = arith.constant 3.200000e+01 : f32
    %270 = vector.broadcast %cst_82 : f32 to vector<8x1xf32>
    %271 = arith.divf %269, %270 : vector<8x1xf32>
    %272 = vector.broadcast %271 : vector<8x1xf32> to vector<8x32xf32>
    %273 = arith.subf %265, %272 : vector<8x32xf32>
    %274 = arith.mulf %273, %273 : vector<8x32xf32>
    %cst_83 = arith.constant dense<0.000000e+00> : vector<8xf32>
    %275 = vector.multi_reduction <add>, %274, %cst_83 [1] : vector<8x32xf32> to vector<8xf32>
    %276 = vector.shape_cast %275 : vector<8xf32> to vector<8x1xf32>
    %cst_84 = arith.constant 3.200000e+01 : f32
    %277 = vector.broadcast %cst_84 : f32 to vector<8x1xf32>
    %278 = arith.divf %276, %277 : vector<8x1xf32>
    %cst_85 = arith.constant 9.99999974E-6 : f32
    %279 = vector.broadcast %cst_85 : f32 to vector<8x1xf32>
    %280 = arith.addf %278, %279 : vector<8x1xf32>
    %281 = math.rsqrt %280 : vector<8x1xf32>
    %282 = vector.broadcast %281 : vector<8x1xf32> to vector<8x32xf32>
    %283 = arith.mulf %273, %282 : vector<8x32xf32>
    %284 = vector.broadcast %266 : vector<1x32xf32> to vector<8x32xf32>
    %285 = arith.mulf %283, %284 : vector<8x32xf32>
    %286 = vector.broadcast %267 : vector<1x32xf32> to vector<8x32xf32>
    %287 = arith.addf %285, %286 : vector<8x32xf32>
    %cst_86 = arith.constant 5.000000e-01 : f32
    %288 = vector.broadcast %cst_86 : f32 to vector<8x32xf32>
    %289 = arith.mulf %288, %287 : vector<8x32xf32>
    %cst_87 = arith.constant 0.707106769 : f32
    %290 = vector.broadcast %cst_87 : f32 to vector<8x32xf32>
    %291 = arith.mulf %287, %290 : vector<8x32xf32>
    %cst_88 = arith.constant 0.000000e+00 : f32
    %292 = vector.broadcast %cst_88 : f32 to vector<8x32xf32>
    %293 = arith.cmpf oge, %291, %292 : vector<8x32xf32>
    %cst_89 = arith.constant 1.000000e+00 : f32
    %cst_90 = arith.constant -1.000000e+00 : f32
    %294 = vector.broadcast %cst_89 : f32 to vector<8x32xf32>
    %295 = vector.broadcast %cst_90 : f32 to vector<8x32xf32>
    %296 = arith.select %293, %294, %295 : vector<8x32xi1>, vector<8x32xf32>
    %297 = math.absf %291 : vector<8x32xf32>
    %cst_91 = arith.constant 0.327591091 : f32
    %298 = vector.broadcast %cst_91 : f32 to vector<8x32xf32>
    %299 = arith.mulf %298, %297 : vector<8x32xf32>
    %cst_92 = arith.constant 1.000000e+00 : f32
    %300 = vector.broadcast %cst_92 : f32 to vector<8x32xf32>
    %301 = arith.addf %300, %299 : vector<8x32xf32>
    %cst_93 = arith.constant 1.000000e+00 : f32
    %302 = vector.broadcast %cst_93 : f32 to vector<8x32xf32>
    %303 = arith.divf %302, %301 : vector<8x32xf32>
    %cst_94 = arith.constant 1.06140542 : f32
    %304 = vector.broadcast %cst_94 : f32 to vector<8x32xf32>
    %305 = arith.mulf %303, %304 : vector<8x32xf32>
    %cst_95 = arith.constant -1.45315206 : f32
    %306 = vector.broadcast %cst_95 : f32 to vector<8x32xf32>
    %307 = arith.addf %306, %305 : vector<8x32xf32>
    %308 = arith.mulf %303, %307 : vector<8x32xf32>
    %cst_96 = arith.constant 1.42141378 : f32
    %309 = vector.broadcast %cst_96 : f32 to vector<8x32xf32>
    %310 = arith.addf %309, %308 : vector<8x32xf32>
    %311 = arith.mulf %303, %310 : vector<8x32xf32>
    %cst_97 = arith.constant -0.284496725 : f32
    %312 = vector.broadcast %cst_97 : f32 to vector<8x32xf32>
    %313 = arith.addf %312, %311 : vector<8x32xf32>
    %314 = arith.mulf %303, %313 : vector<8x32xf32>
    %cst_98 = arith.constant 0.254829586 : f32
    %315 = vector.broadcast %cst_98 : f32 to vector<8x32xf32>
    %316 = arith.addf %315, %314 : vector<8x32xf32>
    %317 = arith.mulf %303, %316 : vector<8x32xf32>
    %cst_99 = arith.constant 0.000000e+00 : f32
    %318 = vector.broadcast %cst_99 : f32 to vector<8x32xf32>
    %319 = arith.subf %318, %297 : vector<8x32xf32>
    %320 = arith.mulf %319, %297 : vector<8x32xf32>
    %321 = math.exp %320 : vector<8x32xf32>
    %322 = arith.mulf %317, %321 : vector<8x32xf32>
    %cst_100 = arith.constant 1.000000e+00 : f32
    %323 = vector.broadcast %cst_100 : f32 to vector<8x32xf32>
    %324 = arith.subf %323, %322 : vector<8x32xf32>
    %325 = arith.mulf %296, %324 : vector<8x32xf32>
    %cst_101 = arith.constant 1.000000e+00 : f32
    %326 = vector.broadcast %cst_101 : f32 to vector<8x32xf32>
    %327 = arith.addf %326, %325 : vector<8x32xf32>
    %328 = arith.mulf %289, %327 : vector<8x32xf32>
    %329 = vector.extract_strided_slice %3 {offsets = [96, 0], sizes = [32, 16], strides = [1, 1]} : vector<128x32xf32> to vector<32x16xf32>
    %cst_102 = arith.constant dense<0.000000e+00> : vector<8x16xf32>
    %330 = tpu.matmul %328, %329, %cst_102 {dimension_numbers = #tpu.dot_dimension_numbers<[1], [0], [0], [1], [0, 0, 1, 1], [], []>} : vector<8x32xf32>, vector<32x16xf32>, vector<8x16xf32> -> vector<8x16xf32>
    %331 = vector.extract_strided_slice %4 {offsets = [11, 0], sizes = [1, 16], strides = [1, 1]} : vector<14x32xf32> to vector<1x16xf32>
    %332 = vector.broadcast %331 : vector<1x16xf32> to vector<8x16xf32>
    %333 = arith.addf %330, %332 : vector<8x16xf32>
    %334 = vector.extract_strided_slice %4 {offsets = [12, 0], sizes = [1, 16], strides = [1, 1]} : vector<14x32xf32> to vector<1x16xf32>
    %335 = vector.extract_strided_slice %4 {offsets = [13, 0], sizes = [1, 16], strides = [1, 1]} : vector<14x32xf32> to vector<1x16xf32>
    %cst_103 = arith.constant dense<0.000000e+00> : vector<8xf32>
    %336 = vector.multi_reduction <add>, %333, %cst_103 [1] : vector<8x16xf32> to vector<8xf32>
    %337 = vector.shape_cast %336 : vector<8xf32> to vector<8x1xf32>
    %cst_104 = arith.constant 1.600000e+01 : f32
    %338 = vector.broadcast %cst_104 : f32 to vector<8x1xf32>
    %339 = arith.divf %337, %338 : vector<8x1xf32>
    %340 = vector.broadcast %339 : vector<8x1xf32> to vector<8x16xf32>
    %341 = arith.subf %333, %340 : vector<8x16xf32>
    %342 = arith.mulf %341, %341 : vector<8x16xf32>
    %cst_105 = arith.constant dense<0.000000e+00> : vector<8xf32>
    %343 = vector.multi_reduction <add>, %342, %cst_105 [1] : vector<8x16xf32> to vector<8xf32>
    %344 = vector.shape_cast %343 : vector<8xf32> to vector<8x1xf32>
    %cst_106 = arith.constant 1.600000e+01 : f32
    %345 = vector.broadcast %cst_106 : f32 to vector<8x1xf32>
    %346 = arith.divf %344, %345 : vector<8x1xf32>
    %cst_107 = arith.constant 9.99999974E-6 : f32
    %347 = vector.broadcast %cst_107 : f32 to vector<8x1xf32>
    %348 = arith.addf %346, %347 : vector<8x1xf32>
    %349 = math.rsqrt %348 : vector<8x1xf32>
    %350 = vector.broadcast %349 : vector<8x1xf32> to vector<8x16xf32>
    %351 = arith.mulf %341, %350 : vector<8x16xf32>
    %352 = vector.broadcast %334 : vector<1x16xf32> to vector<8x16xf32>
    %353 = arith.mulf %351, %352 : vector<8x16xf32>
    %354 = vector.broadcast %335 : vector<1x16xf32> to vector<8x16xf32>
    %355 = arith.addf %353, %354 : vector<8x16xf32>
    %356 = math.tanh %355 : vector<8x16xf32>
    %c0_108 = arith.constant 0 : index
    %c0_109 = arith.constant 0 : index
    %357 = vector.load %arg5[%c0_108, %c0_109] : memref<8x32xf32, #tpu.memory_space<vmem>>, vector<8x16xf32>
    tpu.vector_store %arg5[%c0_108, %c0_109], %356 {strides = array<i32>} : memref<8x32xf32, #tpu.memory_space<vmem>>, vector<8x16xf32>,
    %c0_110 = arith.constant 0 : index
    %c16 = arith.constant 16 : index
    %358 = vector.load %arg5[%c0_110, %c16] : memref<8x32xf32, #tpu.memory_space<vmem>>, vector<8x16xf32>
    tpu.vector_store %arg5[%c0_110, %c16], %109 {strides = array<i32>} : memref<8x32xf32, #tpu.memory_space<vmem>>, vector<8x16xf32>,
    return
  }
}

</mosaic_0001>

<bundles_post_ra>
// kernel: exact_ot_flow_forward.3
= control target key start
LH: loop header
LB: loop body
LE: loop exit
PB: predicated region body
PF: predicated region fallthrough
CT: control target
= control target key end

     0   :  { %v41_v0 = vlaneseq  ;;  %v1533_v4 = vmov 0.0   ;;  %vm1534_vm0 = vmmov 0   ;;  %vm51_vm2 = vcmask 130048   ;;  %s1898_s2 = inlined_call_operand.vmem [shape: f32[8,19], index: 2, kind: input, shape index: {}]   ;;  %s1899_s3 = inlined_call_operand.vmem [shape: f32[128,32], index: 3, kind: input, shape index: {}]   ;;  %s1900_s5 = inlined_call_operand.vmem [shape: f32[8,32], index: 5, kind: output, shape index: {}]   ;;  %s1901_s4 = inlined_call_operand.vmem [shape: f32[14,32], index: 4, kind: input, shape index: {}]   ;;  %s1902_s1 = inlined_call_operand.vmem [shape: f32[8,16], index: 1, kind: input, shape index: {}]   ;;  %s1903_s0 = inlined_call_operand.vmem [shape: f32[8,16], index: 0, kind: input, shape index: {}]  }
   0x1   :  { %v1575_v1 = vld [vmem:[%s1898_s2] sm:$0xff]  ;;  %v1585_v3 = vld [vmem:[%s1899_s3 + $0x8] sm:$0xff]  ;;  %1339 = vmatprep.subr.mxu0 %v1533_v4  ;;  %1341 = vmatprep.mubr.msk.f32.mxu0 %vm1534_vm0, %v1533_v4  ;;  %v1593_v5 = vld [vmem:[%s1899_s3 + $0x10] sm:$0xff]  ;;  %vm137_vm4 = vcmask 64512   ;;  %v1709_v61 = vmov 0.125  }
   0x2   :  { %v1580_v2 = vld [vmem:[%s1899_s3] sm:$0xff]  ;;  %v1598_v6 = vld [vmem:[%s1899_s3 + $0x18] sm:$0xff]  ;;  %v1605_v8 = vshrl.u32 %v41_v0, 7  ;;  %v1607_v9 = vand.u32 127, %v41_v0  ;;  %v1612_v10 = vld [vmem:[%s1899_s3 + $0x28] sm:$0xff] }
   0x3   :  { %v1603_v7 = vld [vmem:[%s1899_s3 + $0x20] sm:$0xff]  ;;  %v1617_v11 = vld [vmem:[%s1899_s3 + $0x30] sm:$0xff]  ;;  %v1622_v12 = vld [vmem:[%s1899_s3 + $0x38] sm:$0xff] }
   0x4   :  { %v1627_v13 = vld [vmem:[%s1899_s3 + $0x40] sm:$0xff]  ;;  %v1632_v14 = vld [vmem:[%s1899_s3 + $0x48] sm:$0xff]  ;;  %v1637_v15 = vld [vmem:[%s1899_s3 + $0x50] sm:$0xff]  ;;  %vm45_vm1 = vcmp.le.s32.totalorder %v1605_v8, %v1607_v9  ;;  %vm48_vm3 = vcmp.eq.s32.totalorder %v1605_v8, %v1607_v9 }
   0x5   :  { %v1644_v16 = vld [vmem:[%s1899_s3 + $0x58] sm:$0xff]  ;;  %v1649_v17 = vld [vmem:[%s1899_s3 + $0x60] sm:$0xff]  ;;  %v1654_v18 = vld [vmem:[%s1899_s3 + $0x68] sm:$0xff]  ;;  %v1660_v19 = vsel %vm45_vm1, 1.0, %v1533_v4  ;;  %v1289_v30 = vsel %vm48_vm3, 1.0, %v1533_v4 }
   0x6   :  { %v1665_v20 = vld [vmem:[%s1899_s3 + $0x70] sm:$0xff]  ;;  %v1670_v21 = vld [vmem:[%s1899_s3 + $0x78] sm:$0xff]  ;;  %v1675_v22 = vld [vmem:[%s1901_s4] sm:$0xff] }
   0x7   :  { %v1680_v23 = vld [vmem:[%s1901_s4 + $0x8] sm:$0x3f]  ;;  %v1685_v24 = vld [vmem:[%s1902_s1] sm:$0xff] }
   0x8   :  { %v1690_v25 = vld [vmem:[%s1903_s0] sm:$0xff]  ;;  %1340 = vmatpush3.xpose.msk.msra.mxu0 %vm51_vm2, %v1685_v24  ;;  %v132_v26 = vmul.f32 %v1685_v24, %v1685_v24  ;;  %s1711_s0 = smov 0  }
   0x9   :  { %v128_v27 = vmul.f32 %v1690_v25, %v1690_v25 }
   0xa   :  { %v133_v28 = vsel %vm51_vm2, %v132_v26, 0.0 }
   0xb   :  { %1342 = vmatmul.mubr.msk.f32.vlgmr.msra.gmra.mrb[0].mxu0 %vm51_vm2, %v1690_v25  ;;  %134 = vadd.xlane.f32.xlu0 %v133_v28  ;;  %v129_v29 = vsel %vm51_vm2, %v128_v27, 0.0 }
   0xf   :  { %130 = vadd.xlane.f32.xlu0 %v129_v29 }
  0x98   :  { %v135_v31 = vpop.xlane.xlu0 %134 }
  0x99   :  { %v136_v32 = vmul.f32 %v1289_v30, %v135_v31 }
  0x9b   :  { %v138_v33 = vsel %vm137_vm4, %v136_v32, 0.0 }
  0x9c   :  { %v139_v34 = vrot.slane %v138_v33, 4  ;;  %v131_v40 = vpop.xlane.xlu0 %130 }
  0x9e   :  { %v140_v35 = vadd.f32 %v139_v34, %v138_v33 }
  0xa0   :  { %v141_v36 = vrot.slane %v140_v35, 2 }
  0xa2   :  { %v142_v37 = vadd.f32 %v141_v36, %v140_v35 }
  0xa4   :  { %v143_v38 = vrot.slane %v142_v37, 1 }
  0xa6   :  { %v144_v39 = vadd.f32 %v143_v38, %v142_v37 }
  0xa8   :  { %v145_v42 = vadd.f32 %v144_v39, %v131_v40 }
  0xde   :  { %v124_v41 = vpop.f32.mrb[0].mxu0 }
  0xdf   :  { %v146_v43 = vmul.f32 2.0, %v124_v41  ;;  %v1343_v44 = vpop.f32.mrb[1].mxu0 }
  0xe1   :  { %v147_v45 = vsub.f32 %v145_v42, %v146_v43 }
  0xe3   :  { %v148_v46 = vsel %vm137_vm4, %v147_v45, -inf  ;;  %v157_v56 = vsub.f32 0.0, %v147_v45 }
  0xe4   :  { %149 = vmax.xlane.f32.xlu1 %v148_v46 }
 0x171   :  { %v150_v47 = vpop.xlane.xlu1 %149 }
 0x172   :  { %v151_v48 = vrot.slane %v150_v47, 4 }
 0x174   :  { %v152_v49 = vmax.f32 %v150_v47, %v151_v48 }
 0x176   :  { %v153_v50 = vrot.slane %v152_v49, 2 }
 0x178   :  { %v154_v51 = vmax.f32 %v152_v49, %v153_v50 }
 0x17a   :  { %v155_v52 = vrot.slane %v154_v51, 1 }
 0x17c   :  { %v156_v53 = vmax.f32 %v154_v51, %v155_v52 }
 0x17e   :  { %v158_v54 = vmul.f32 0.05, %v156_v53 }
 0x180   :  { %v159_v55 = vadd.f32 1e-12, %v158_v54 }
 0x182   :  { %1467 = vrcp.f32 %v159_v55 }
 0x18c   :  { %v1468_v57 = vpop.eup %1467 }
 0x18d   :  { %v161_v58 = vmul.f32 %v1468_v57, %v157_v56 }
 0x18f   :  { %v162_v59 = vmul.f32 1.442695, %v161_v58 }
 0x191   :  { %1469 = vpow2.f32 %v162_v59 }
 0x19b   :  { %v1707_v60 = vpop.eup %1469 }
 0x19c LB: > { %v172_v62 = vmul.f32 %v1527_v61, %v1707_v60  ;;  %s169_s0 = sadd.s32 1, %s1531_s0   ;;  %s1531_s0 = sphi %s1711_s0, %s169_s0   ;;  %v1527_v61 = vphi %v1709_v61, %v1904_v61  }
 0x19d   : > { %p166_p0 = scmp.ge.s32.totalorder %s169_s0, 20  }
 0x19e   : > { %v173_v63 = vsel %vm137_vm4, %v172_v62, 0.0  ;;  %1344 = vmatprep.subr.mxu1 (%p166_p0), %v1533_v4  ;;  %1346 = vmatprep.mubr.msk.f32.mxu1 (%p166_p0), %vm1534_vm0, %v1533_v4  ;;  %vm987_vm10 = vcmask (%p166_p0), 261120   ;;  %s1541_s1 = smov (%p166_p0), 16   ;;  %vm1271_vm13 = vcmask (%p166_p0), 261248  }
 0x19f   : > { %174 = vadd.xlane.f32.xlu0 %v173_v63  ;;  %1345 = vmatpush3.msra.mxu1 (%p166_p0), %v1690_v25 }
 0x1a0   :  { %1354 = vmatprep.subr.mxu0 (%p166_p0), %v1533_v4  ;;  %1349 = vmatprep.subr.mxu1 (%p166_p0), %v1533_v4 }
 0x1a1   :  { %1356 = vmatprep.mubr.msk.f32.mxu0 (%p166_p0), %vm1534_vm0, %v1533_v4 }
 0x22c   : > { %v175_v0 = vpop.xlane.xlu0 %174 }
 0x22d   : > { %v176_v26 = vadd.f32 1e-30, %v175_v0 }
 0x22f   : > { %1471 = vrcp.f32 %v176_v26 }
 0x239   : > { %v1472_v27 = vpop.eup %1471 }
 0x23a   : > { %v178_v28 = vmul.f32 0.125, %v1472_v27 }
 0x23c   : > { %v179_v29 = vmul.f32 %v1707_v60, %v178_v28 }
 0x23e   : > { %v180_v30 = vsel %vm137_vm4, %v179_v29, 0.0 }
 0x23f   : > { %v181_v31 = vrot.slane %v180_v30, 4 }
 0x241   : > { %v182_v32 = vadd.f32 %v181_v31, %v180_v30 }
 0x243   : > { %v183_v33 = vrot.slane %v182_v32, 2 }
 0x245   : > { %v184_v34 = vadd.f32 %v183_v33, %v182_v32 }
 0x247   : > { %v185_v35 = vrot.slane %v184_v34, 1 }
 0x249   : > { %v186_v36 = vadd.f32 %v185_v35, %v184_v34 }
 0x24b   : > { %v187_v37 = vadd.f32 1e-30, %v186_v36 }
 0x24d   : > { %1473 = vrcp.f32 %v187_v37 }
 0x257   : > { %v1474_v38 = vpop.eup %1473 }
 0x258   : > { %v189_v39 = vmul.f32 0.125, %v1474_v38 }
 0x25a   : > { %v190_v40 = vmul.f32 %v1707_v60, %v189_v39 }
 0x25c   : > { %v191_v41 = vsel %vm137_vm4, %v190_v40, 0.0 }
 0x25d   : > { %192 = vadd.xlane.f32.xlu0 %v191_v41 }
 0x2ea   : > { %v193_v42 = vpop.xlane.xlu0 %192 }
 0x2eb   : > { %v194_v43 = vadd.f32 1e-30, %v193_v42 }
 0x2ed   : > { %1475 = vrcp.f32 %v194_v43 }
 0x2f7   : > { %v1476_v44 = vpop.eup %1475 }
 0x2f8   : > { %v196_v45 = vmul.f32 0.125, %v1476_v44 }
 0x2fa   : > { %v197_v46 = vmul.f32 %v1707_v60, %v196_v45 }
 0x2fc   : > { %v198_v47 = vsel %vm137_vm4, %v197_v46, 0.0 }
 0x2fd   : > { %v199_v48 = vrot.slane %v198_v47, 4 }
 0x2ff   : > { %v200_v49 = vadd.f32 %v199_v48, %v198_v47 }
 0x301   : > { %v201_v50 = vrot.slane %v200_v49, 2 }
 0x303   : > { %v202_v51 = vadd.f32 %v201_v50, %v200_v49 }
 0x305   : > { %v203_v52 = vrot.slane %v202_v51, 1 }
 0x307   : > { %v204_v53 = vadd.f32 %v203_v52, %v202_v51 }
 0x309   : > { %v205_v54 = vadd.f32 1e-30, %v204_v53 }
 0x30b   : > { %1477 = vrcp.f32 %v205_v54 }
 0x315   : > { %v1478_v55 = vpop.eup %1477 }
 0x316   : > { %v207_v56 = vmul.f32 0.125, %v1478_v55 }
 0x318   : > { %v208_v57 = vmul.f32 %v1707_v60, %v207_v56 }
 0x31a   : > { %v209_v58 = vsel %vm137_vm4, %v208_v57, 0.0 }
 0x31b   : > { %210 = vadd.xlane.f32.xlu1 %v209_v58 }
 0x3a8   : > { %v211_v59 = vpop.xlane.xlu1 %210 }
 0x3a9   : > { %v212_v61 = vadd.f32 1e-30, %v211_v59 }
 0x3ab   : > { %1479 = vrcp.f32 %v212_v61 }
 0x3b5   : > { %v1480_v62 = vpop.eup %1479 }
 0x3b6   : > { %v214_v63 = vmul.f32 0.125, %v1480_v62 }
 0x3b8   : > { %v215_v0 = vmul.f32 %v1707_v60, %v214_v63 }
 0x3ba   : > { %v216_v26 = vsel %vm137_vm4, %v215_v0, 0.0 }
 0x3bb   : > { %v217_v27 = vrot.slane %v216_v26, 4 }
 0x3bd   : > { %v218_v28 = vadd.f32 %v217_v27, %v216_v26 }
 0x3bf   : > { %v219_v29 = vrot.slane %v218_v28, 2 }
 0x3c1   : > { %v220_v30 = vadd.f32 %v219_v29, %v218_v28 }
 0x3c3   : > { %v221_v31 = vrot.slane %v220_v30, 1 }
 0x3c5   : > { %v222_v32 = vadd.f32 %v221_v31, %v220_v30 }
 0x3c7   : > { %v223_v33 = vadd.f32 1e-30, %v222_v32 }
 0x3c9   : > { %1481 = vrcp.f32 %v223_v33 }
 0x3d3   : > { %v1482_v34 = vpop.eup %1481 }
 0x3d4   : > { %v225_v35 = vmul.f32 0.125, %v1482_v34  ;;  %v1535_v34 = vmov (%p166_p0), 16  }
 0x3d5   :  { %1491 = vset.pattern.permute.xlu0 (%p166_p0), %v1535_v34 }
 0x3d6   : > { %v226_v36 = vmul.f32 %v1707_v60, %v225_v35 }
 0x3d8   : > { %v227_v37 = vsel %vm137_vm4, %v226_v36, 0.0 }
 0x3d9   : > { %228 = vadd.xlane.f32.xlu1 %v227_v37 }
 0x466   : > { %v229_v38 = vpop.xlane.xlu1 %228 }
 0x467   : > { %v230_v39 = vadd.f32 1e-30, %v229_v38 }
 0x469   : > { %1483 = vrcp.f32 %v230_v39 }
 0x473   : > { %v1484_v40 = vpop.eup %1483 }
 0x474   : > { %v232_v41 = vmul.f32 0.125, %v1484_v40 }
 0x476   : > { %v233_v42 = vmul.f32 %v1707_v60, %v232_v41 }
 0x478   : > { %v234_v43 = vsel %vm137_vm4, %v233_v42, 0.0 }
 0x479   : > { %v235_v44 = vrot.slane %v234_v43, 4 }
 0x47b   : > { %v236_v45 = vadd.f32 %v235_v44, %v234_v43 }
 0x47d   : > { %v237_v46 = vrot.slane %v236_v45, 2 }
 0x47f   : > { %v238_v47 = vadd.f32 %v237_v46, %v236_v45 }
 0x481   : > { %v239_v48 = vrot.slane %v238_v47, 1 }
 0x483   : > { %v240_v49 = vadd.f32 %v239_v48, %v238_v47 }
 0x485   : > { %v241_v50 = vadd.f32 1e-30, %v240_v49 }
 0x487   : > { %1485 = vrcp.f32 %v241_v50 }
 0x491   : > { %v1486_v51 = vpop.eup %1485 }
 0x492   : > { %v243_v52 = vmul.f32 0.125, %v1486_v51 }
 0x494   : > { %v244_v53 = vmul.f32 %v1707_v60, %v243_v52  ;;  %v1536_v52 = vmov (%p166_p0), 18  }
 0x495   :  { %1492 = vset.pattern.permute.xlu1 (%p166_p0), %v1536_v52 }
 0x496   : > { %v245_v54 = vsel %vm137_vm4, %v244_v53, 0.0 }
 0x497   : > { %246 = vadd.xlane.f32.xlu0 %v245_v54 }
 0x524   : > { %v247_v55 = vpop.xlane.xlu0 %246 }
 0x525   : > { %v248_v56 = vadd.f32 1e-30, %v247_v55 }
 0x527   : > { %1487 = vrcp.f32 %v248_v56  ;;  %v626_v56 = vsub.s32 (%p166_p0), 0, %v1605_v8 }
 0x531   : > { %v1488_v57 = vpop.eup %1487 }
 0x532   : > { %v250_v58 = vmul.f32 0.125, %v1488_v57 }
 0x534   : > { %v251_v59 = vmul.f32 %v1707_v60, %v250_v58  ;;  %v631_v58 = vsub.s32 (%p166_p0), 1, %v1605_v8 }
 0x536   : > { %v252_v61 = vsel %vm137_vm4, %v251_v59, 0.0 }
 0x537   : > { %v253_v62 = vrot.slane %v252_v61, 4 }
 0x539   : > { %v254_v63 = vadd.f32 %v253_v62, %v252_v61 }
 0x53b   : > { %v255_v0 = vrot.slane %v254_v63, 2 }
 0x53d   : > { %v256_v26 = vadd.f32 %v255_v0, %v254_v63 }
 0x53f   : > { %v257_v27 = vrot.slane %v256_v26, 1 }
 0x541   : > { %v258_v28 = vadd.f32 %v257_v27, %v256_v26  ;;  %v1537_v27 = vmov (%p166_p0), 1.0  }
 0x542   :  { %1355 = vmatpush3.msk.msra.mxu0 (%p166_p0), %vm45_vm1, %v1537_v27 }
 0x543   : > { %v259_v29 = vadd.f32 1e-30, %v258_v28 }
 0x545   : > { %1489 = vrcp.f32 %v259_v29 }
 0x54c   :  { %168 = sbr.rel (!%p166_p0) target bundleno = 412 (0x19c), region = 47 }
 0x54f   : > { %v1490_v30 = vpop.eup %1489 }
 0x550   : > { %v261_v31 = vmul.f32 0.125, %v1490_v30  }
 0x552   : > { %v1904_v61 = vmov %v261_v31  ;;  %v263_v32 = vmul.f32 (%p166_p0), %v261_v31, %v251_v59  ;;  %v627_v59 = vrot.slane (%p166_p0), %v1675_v22, %v626_v56 }
 0x553   :  { %v632_v61 = vrot.slane %v1675_v22, %v631_v58 }
 0x554   :  { %v264_v33 = vsel %vm137_vm4, %v263_v32, 0.0 }
 0x555   :  { %265 = vadd.xlane.f32.xlu0 %v264_v33 }
 0x5e2   :  { %v266_v60 = vpop.xlane.xlu0 %265 }
 0x5e3   :  { %v267_v35 = vrot.slane %v266_v60, 4  ;;  %v273_v41 = vmul.f32 %v1660_v19, %v266_v60 }
 0x5e5   :  { %v268_v36 = vadd.f32 %v267_v35, %v266_v60  ;;  %v274_v42 = vsel %vm137_vm4, %v273_v41, 0.0 }
 0x5e6   :  { %v275_v43 = vrot.slane %v274_v42, 4 }
 0x5e7   :  { %v269_v37 = vrot.slane %v268_v36, 2 }
 0x5e8   :  { %v276_v44 = vadd.f32 %v275_v43, %v274_v42 }
 0x5e9   :  { %v270_v38 = vadd.f32 %v269_v37, %v268_v36 }
 0x5ea   :  { %v277_v45 = vrot.slane %v276_v44, 2 }
 0x5eb   :  { %v271_v39 = vrot.slane %v270_v38, 1 }
 0x5ec   :  { %v278_v46 = vadd.f32 %v277_v45, %v276_v44  ;;  %v613_v45 = vsub.f32 1.0, %v1575_v1 }
 0x5ed   :  { %v272_v40 = vadd.f32 %v271_v39, %v270_v38  ;;  %v1415_v39 = vpack.c.bf16 %v1585_v3, %v1580_v2 }
 0x5ee   :  { %v279_v47 = vrot.slane %v278_v46, 1 }
 0x5ef   :  { %v281_v25 = vmul.f32 %v272_v40, %v1575_v1 }
 0x5f0   :  { %v280_v48 = vadd.f32 %v279_v47, %v278_v46  ;;  %v650_v47 = vsub.s32 2, %v1605_v8 }
 0x5f1   :  { %284 = vperm.xlu0 %1491, %v281_v25   ;;  %v1539_v25 = vmov 0.0|0.0  }
 0x5f2   :  { %1414 = vmatprep.subr.bf16.mxu0 %v1539_v25 }
 0x5f5   :  { %1494 = vset.pattern.permute.xlu0 %v1536_v52 }
 0x670   :  { %v285_v49 = vpop.permute.xlu0 %284 }
 0x671   :  { %vm287_vm5 = vcmp.le.f32.partialorder %v280_v48, %v285_v49  ;;  %v655_v48 = vsub.s32 3, %v1605_v8  ;;  %v651_v49 = vrot.slane %v1675_v22, %v650_v47 }
 0x672   :  { %v1292_v50 = vsel %vm287_vm5, 1.0, %v1533_v4 }
 0x673   :  { %v290_v51 = vsel %vm137_vm4, %v1292_v50, 0.0  ;;  %v656_v52 = vrot.slane %v1675_v22, %v655_v48 }
 0x674   :  { %291 = vadd.xlane.f32.xlu1 %v290_v51 }
 0x685   :  { %609 = vperm.xlu1 %1492, %v1575_v1  }
 0x701   :  { %v292_v19 = vpop.xlane.xlu1 %291 }
 0x702   :  { %v293_v53 = vmin.f32 %v292_v19, 7.0 }
 0x704   :  { %v1438_v54 = vtrunc.f32 %v293_v53 }
 0x705   :  { %v1772_v62 = vpop.permute.xlu1 %609 }
 0x706   :  { %v1439_v55 = vcvt.f32.s32 %v1438_v54  ;;  %v628_v63 = vmul.f32 %v627_v59, %v1772_v62 }
 0x708   :  { %vm295_vm6 = vcmp.eq.s32.totalorder %v1607_v9, %v1439_v55  ;;  %v633_v0 = vadd.f32 %v632_v61, %v628_v63 }
 0x709   :  { %v1293_v57 = vsel %vm295_vm6, 1.0, %v1533_v4 }
 0x70a   :  { %1347 = vmatmul.mubr.msk.f32.vlgmr.msra.gmra.mrb[0].mxu1 %vm137_vm4, %v1293_v57  ;;  %v634_v26 = vsel %vm51_vm2, %v633_v0, 0.0 }
 0x70b   :  { %1350 = vmatpush3.msra.mxu1 %v263_v32  ;;  %1351 = vmatprep.mubr.msk.f32.mxu1 %vm1534_vm0, %v1533_v4  ;;  %v1538_v32 = vmov 17  }
 0x70c   :  { %1359 = vmatprep.subr.mxu1 %v1533_v4  ;;  %635 = vadd.xlane.f32.xlu0 %v634_v26 }
 0x70d   :  { %1493 = vset.pattern.permute.xlu1 %v1538_v32 }
 0x70e   :  { %1352 = vmatmul.mubr.msk.f32.vlgmr.msra.gmra.mrb[2].mxu1 %vm137_vm4, %v1293_v57 }
 0x70f   :  { %1360 = vmatpush3.msra.mxu1 %v1685_v24  ;;  %1361 = vmatprep.mubr.msk.f32.mxu1 %vm1534_vm0, %v1533_v4 }
 0x710   :  { %1417 = vmatprep.subr.bf16.mxu1 %v1539_v25 }
 0x799   :  { %v636_v60 = vpop.xlane.xlu0 %635 }
 0x79a   :  { %v638_v35 = vmul.f32 0.0625, %v636_v60 }
 0x79c   :  { %v639_v36 = vsub.f32 %v633_v0, %v638_v35 }
 0x79e   :  { %v640_v37 = vmul.f32 %v639_v36, %v639_v36 }
 0x7a0   :  { %v641_v38 = vsel %vm51_vm2, %v640_v37, 0.0 }
 0x7dd   :  { %v1782_v28 = vpop.f32.mrb[0].mxu1 }
 0x7de   :  { %v1348_v29 = vpop.f32.mrb[1].mxu1 }
 0x7e1   :  { %v437_v30 = vpop.f32.mrb[2].mxu1 }
 0x7e2   :  { %v1353_v31 = vpop.f32.mrb[3].mxu1  ;;  %1357 = vmatmul.mubr.msk.f32.vlgmr.msra.gmra.mrb[2].mxu0 %vm137_vm4, %v437_v30  ;;  %v514_v24 = vsel %vm137_vm4, %v437_v30, 0.0 }
 0x7e3   :  { %515 = vadd.xlane.f32.xlu1 %v514_v24  ;;  %1368 = vmatprep.mubr.msk.f32.mxu0 %vm1534_vm0, %v1533_v4 }
 0x7e4   :  { %1416 = vmatpush3.bf16.msra.mxu0 %v1415_v39 }
 0x7e5   :  { %1420 = vmatprep.subr.bf16.mxu0 %v1539_v25 }
 0x870   :  { %v516_v33 = vpop.xlane.xlu1 %515 }
 0x871   :  { %v517_v34 = vmul.f32 %v516_v33, %v1575_v1 }
 0x873   :  { %520 = vperm.xlu1 %1493, %v517_v34  }
 0x897   :  { %642 = vadd.xlane.f32.xlu1 %v641_v38  ;;  %v1540_v38 = vmov -1.0  }
 0x8b5   :  { %v510_v40 = vpop.f32.mrb[2].mxu0 }
 0x8b6   :  { %v1358_v41 = vpop.f32.mrb[3].mxu0 }
 0x8f2   :  { %v521_v42 = vpop.permute.xlu1 %520 }
 0x8f3   :  { %vm523_vm7 = vcmp.le.f32.partialorder %v510_v40, %v521_v42 }
 0x8f4   :  { %v1298_v43 = vsel %vm523_vm7, 1.0, %v1533_v4 }
 0x8f5   :  { %v526_v44 = vsel %vm137_vm4, %v1298_v43, 0.0 }
 0x8f6   :  { %527 = vadd.xlane.f32.xlu0 %v526_v44 }
 0x90c   :  { %616 = vperm.xlu0 %1494, %v613_v45  }
 0x924   :  { %v643_v2 = vpop.xlane.xlu1 %642 }
 0x925   :  { %v644_v3 = vmul.f32 0.0625, %v643_v2 }
 0x927   :  { %v645_v46 = vadd.f32 1e-05, %v644_v3 }
 0x929   :  { %1495 = vrsqrt.f32 %v645_v46 }
 0x933   :  { %v1496_v50 = vpop.eup %1495 }
 0x934   :  { %v647_v51 = vmul.f32 %v1496_v50, %v639_v36  ;;  %v1421_v50 = vpack.c.bf16 %v1598_v6, %v1593_v5  ;;  %v621_v6 = vmul.f32 0.1, %v1575_v1 }
 0x936   :  { %v652_v19 = vmul.f32 %v651_v49, %v647_v51  ;;  %v1418_v49 = vpack.c.bf16 %v1612_v10, %v1603_v7  ;;  %v1424_v7 = vpack.c.bf16 %v1622_v12, %v1617_v11  ;;  %v984_v12 = vsub.s32 5, %v1605_v8 }
 0x938   :  { %v657_v53 = vadd.f32 %v656_v52, %v652_v19  ;;  %v687_v52 = vsub.s32 4, %v1605_v8 }
 0x93a   :  { %v659_v54 = vmul.f32 0.70710677, %v657_v53  ;;  %v658_v41 = vmul.f32 0.5, %v657_v53  ;;  %v688_v53 = vrot.slane %v1675_v22, %v687_v52 }
 0x93c   :  { %v662_v55 = vand.u32 2147483647, %v659_v54  ;;  %vm660_vm8 = vcmp.ge.f32.partialorder %v659_v54, 0.0 }
 0x93d   :  { %v661_v39 = vsel %vm660_vm8, 1.0, %v1540_v38 }
 0x93e   :  { %v663_v57 = vmul.f32 0.3275911, %v662_v55  ;;  %v676_v61 = vsub.f32 0.0, %v662_v55 }
 0x940   :  { %v664_v59 = vadd.f32 1.0, %v663_v57  ;;  %v677_v0 = vmul.f32 %v676_v61, %v662_v55 }
 0x942   :  { %1497 = vrcp.f32 %v664_v59  ;;  %v678_v29 = vmul.f32 1.442695, %v677_v0 }
 0x944   :  { %1499 = vpow2.f32 %v678_v29  ;;  %v985_v29 = vrot.slane %v1675_v22, %v984_v12 }
 0x94c   :  { %v1498_v63 = vpop.eup %1497 }
 0x94d   :  { %v667_v26 = vmul.f32 1.0614054, %v1498_v63 }
 0x94e   :  { %v1500_v35 = vpop.eup %1499 }
 0x94f   :  { %v668_v27 = vadd.f32 -1.4531521, %v667_v26 }
 0x951   :  { %v669_v30 = vmul.f32 %v1498_v63, %v668_v27 }
 0x953   :  { %v670_v31 = vadd.f32 1.4214138, %v669_v30 }
 0x955   :  { %v671_v24 = vmul.f32 %v1498_v63, %v670_v31 }
 0x957   :  { %v672_v32 = vadd.f32 -0.28449672, %v671_v24 }
 0x959   :  { %v673_v33 = vmul.f32 %v1498_v63, %v672_v32 }
 0x95b   :  { %v674_v34 = vadd.f32 0.2548296, %v673_v33 }
 0x95d   :  { %v675_v60 = vmul.f32 %v1498_v63, %v674_v34 }
 0x95f   :  { %v680_v36 = vmul.f32 %v1500_v35, %v675_v60  ;;  %v1427_v35 = vpack.c.bf16 %v1632_v14, %v1627_v13 }
 0x961   :  { %v681_v37 = vsub.f32 1.0, %v680_v36  ;;  %v1430_v36 = vpack.c.bf16 %v1644_v16, %v1637_v15 }
 0x963   :  { %v682_v40 = vmul.f32 %v681_v37, %v661_v39 }
 0x965   :  { %v683_v42 = vadd.f32 1.0, %v682_v40 }
 0x967   :  { %v684_v43 = vmul.f32 %v683_v42, %v658_v41  ;;  %v1004_v41 = vsub.s32 6, %v1605_v8  ;;  %v1009_v42 = vsub.s32 7, %v1605_v8 }
 0x969   :  { %1369 = vmatmul.mubr.msk.f32.vlgmr.msra.gmra.mrb[4].mxu0 %vm51_vm2, %v684_v43  ;;  %v1005_v43 = vrot.slane %v1675_v22, %v1004_v41  ;;  %v1010_v13 = vrot.slane %v1675_v22, %v1009_v42 }
 0x96a   :  { %1382 = vmatprep.mubr.msk.f32.mxu0 %vm1534_vm0, %v1533_v4  ;;  %1422 = vmatpush3.bf16.msra.mxu0 %v1421_v50 }
 0x96b   :  { %1426 = vmatprep.subr.bf16.mxu0 %v1539_v25 }
 0x983   :  { %v528_v44 = vpop.xlane.xlu0 %527 }
 0x984   :  { %v529_v45 = vmin.f32 %v528_v44, 7.0 }
 0x986   :  { %v1440_v2 = vtrunc.f32 %v529_v45 }
 0x988   :  { %v1441_v3 = vcvt.f32.s32 %v1440_v2 }
 0x98a   :  { %vm531_vm9 = vcmp.eq.s32.totalorder %v1607_v9, %v1441_v3 }
 0x98b   :  { %v1299_v46 = vsel %vm531_vm9, 1.0, %v1533_v4  ;;  %v617_v19 = vpop.permute.xlu0 %616 }
 0x98c   :  { %1362 = vmatmul.mubr.msk.f32.vlgmr.msra.gmra.mrb[4].mxu1 %vm137_vm4, %v1299_v46  ;;  %v619_v10 = vmul.f32 %v617_v19, %v1782_v28 }
 0x98d   :  { %1375 = vmatprep.mubr.msk.f32.mxu1 %vm1534_vm0, %v1533_v4  ;;  %1419 = vmatpush3.bf16.msra.mxu1 %v1418_v49 }
 0x98e   :  { %1423 = vmatprep.subr.bf16.mxu1 %v1539_v25 }
 0xa3c   :  { %v758_v9 = vpop.f32.mrb[4].mxu0 }
 0xa3d   :  { %v1370_v51 = vpop.f32.mrb[5].mxu0  ;;  %v759_v61 = vadd.f32 %v758_v9, %v688_v53 }
 0xa5f   :  { %v603_v54 = vpop.f32.mrb[4].mxu1 }
 0xa60   :  { %v612_v5 = vmul.f32 %v1772_v62, %v603_v54  ;;  %v623_v55 = vsub.f32 %v603_v54, %v1782_v28  ;;  %v1363_v57 = vpop.f32.mrb[5].mxu1 }
 0xa62   :  { %v620_v59 = vadd.f32 %v619_v10, %v612_v5  ;;  %1376 = vmatmul.mubr.msk.f32.vlgmr.msra.gmra.mrb[6].mxu1 %vm51_vm2, %v623_v55 }
 0xa63   :  { %1425 = vmatpush3.bf16.msra.mxu1 %v1424_v7  ;;  %1389 = vmatprep.mubr.msk.f32.mxu1 %vm1534_vm0, %v1533_v4 }
 0xa64   :  { %v1834_v63 = vadd.f32 %v621_v6, %v620_v59  ;;  %1432 = vmatprep.subr.bf16.mxu1 %v1539_v25 }
 0xa66   :  { %1383 = vmatmul.mubr.msk.f32.vlgmr.msra.gmra.mrb[6].mxu0 %vm51_vm2, %v1834_v63  ;;  %1390 = vmatmul.mubr.msk.f32.vlgmr.msra.gmra.mrb[8].mxu1 %vm51_vm2, %v759_v61 }
 0xa67   :  { %1400 = vmatprep.mubr.msk.f32.mxu0 %vm1534_vm0, %v1533_v4  ;;  %1411 = vmatprep.mubr.msk.f32.mxu1 %vm1534_vm0, %v1533_v4 }
 0xa68   :  { %1428 = vmatpush3.bf16.msra.mxu0 %v1427_v35 }
 0xa69   :  { %1429 = vmatprep.subr.bf16.mxu0 %v1539_v25 }
 0xa6c   :  { %1431 = vmatpush3.bf16.msra.mxu0 %v1430_v36 }
 0xb35   :  { %v831_v1 = vpop.f32.mrb[6].mxu1 }
 0xb36   :  { %v1377_v11 = vpop.f32.mrb[7].mxu1 }
 0xb39   :  { %v904_v62 = vpop.f32.mrb[6].mxu0  ;;  %v977_v28 = vpop.f32.mrb[8].mxu1 }
 0xb3a   :  { %v905_v0 = vadd.f32 %v904_v62, %v831_v1  ;;  %v1384_v26 = vpop.f32.mrb[7].mxu0  ;;  %v1391_v27 = vpop.f32.mrb[9].mxu1 }
 0xb3b   :  { %v1042_v26 = vrot.slane %v1680_v23, %v626_v56  ;;  %v1436_v56 = vpack.c.bf16 %v1670_v21, %v1665_v20 }
 0xb3c   :  { %v981_v30 = vadd.f32 %v977_v28, %v905_v0 }
 0xb3e   :  { %v986_v31 = vadd.f32 %v985_v29, %v981_v30 }
 0xb40   :  { %v988_v24 = vsel %vm987_vm10, %v986_v31, 0.0 }
 0xb41   :  { %989 = vadd.xlane.f32.xlu1 %v988_v24 }
 0xbce   :  { %v990_v4 = vpop.xlane.xlu1 %989 }
 0xbcf   :  { %v992_v32 = vmul.f32 0.03125, %v990_v4 }
 0xbd1   :  { %v993_v33 = vsub.f32 %v986_v31, %v992_v32 }
 0xbd3   :  { %v994_v34 = vmul.f32 %v993_v33, %v993_v33 }
 0xbd5   :  { %v995_v60 = vsel %vm987_vm10, %v994_v34, 0.0 }
 0xbd6   :  { %996 = vadd.xlane.f32.xlu1 %v995_v60  ;;  %v1433_v60 = vpack.c.bf16 %v1654_v18, %v1649_v17  ;;  %v1137_v17 = vrot.slane %v1680_v23, %v650_v47 }
 0xbd8   :  { %1434 = vmatpush3.bf16.msra.mxu1 %v1433_v60 }
 0xbd9   :  { %1435 = vmatprep.subr.bf16.mxu1 %v1539_v25 }
 0xbdc   :  { %1437 = vmatpush3.bf16.msra.mxu1 %v1436_v56 }
 0xc63   :  { %v997_v37 = vpop.xlane.xlu1 %996 }
 0xc64   :  { %v998_v39 = vmul.f32 0.03125, %v997_v37 }
 0xc66   :  { %v999_v40 = vadd.f32 1e-05, %v998_v39  ;;  %v1132_v39 = vrot.slane %v1680_v23, %v631_v58 }
 0xc68   :  { %1501 = vrsqrt.f32 %v999_v40 }
 0xc72   :  { %v1502_v44 = vpop.eup %1501 }
 0xc73   :  { %v1001_v45 = vmul.f32 %v1502_v44, %v993_v33 }
 0xc75   :  { %v1006_v14 = vmul.f32 %v1005_v43, %v1001_v45 }
 0xc77   :  { %v1011_v2 = vadd.f32 %v1010_v13, %v1006_v14 }
 0xc79   :  { %v1013_v15 = vmul.f32 0.70710677, %v1011_v2  ;;  %v1012_v62 = vmul.f32 0.5, %v1011_v2 }
 0xc7b   :  { %v1016_v16 = vand.u32 2147483647, %v1013_v15  ;;  %vm1014_vm11 = vcmp.ge.f32.partialorder %v1013_v15, 0.0 }
 0xc7c   :  { %v1015_v1 = vsel %vm1014_vm11, 1.0, %v1540_v38 }
 0xc7d   :  { %v1017_v3 = vmul.f32 0.3275911, %v1016_v16  ;;  %v1030_v49 = vsub.f32 0.0, %v1016_v16 }
 0xc7f   :  { %v1018_v46 = vadd.f32 1.0, %v1017_v3  ;;  %v1031_v9 = vmul.f32 %v1030_v49, %v1016_v16 }
 0xc81   :  { %1503 = vrcp.f32 %v1018_v46  ;;  %v1032_v53 = vmul.f32 1.442695, %v1031_v9 }
 0xc83   :  { %1505 = vpow2.f32 %v1032_v53 }
 0xc8b   :  { %v1504_v50 = vpop.eup %1503 }
 0xc8c   :  { %v1021_v51 = vmul.f32 1.0614054, %v1504_v50 }
 0xc8d   :  { %v1506_v57 = vpop.eup %1505 }
 0xc8e   :  { %v1022_v19 = vadd.f32 -1.4531521, %v1021_v51 }
 0xc90   :  { %v1023_v54 = vmul.f32 %v1504_v50, %v1022_v19 }
 0xc92   :  { %v1024_v7 = vadd.f32 1.4214138, %v1023_v54 }
 0xc94   :  { %v1025_v10 = vmul.f32 %v1504_v50, %v1024_v7 }
 0xc96   :  { %v1026_v5 = vadd.f32 -0.28449672, %v1025_v10 }
 0xc98   :  { %v1027_v6 = vmul.f32 %v1504_v50, %v1026_v5 }
 0xc9a   :  { %v1028_v22 = vadd.f32 0.2548296, %v1027_v6  ;;  %v1169_v6 = vrot.slane %v1680_v23, %v655_v48  ;;  %v1259_v48 = vrot.slane %v1680_v23, %v687_v52 }
 0xc9c   :  { %v1029_v55 = vmul.f32 %v1504_v50, %v1028_v22 }
 0xc9e   :  { %v1034_v59 = vmul.f32 %v1506_v57, %v1029_v55 }
 0xca0   :  { %v1035_v61 = vsub.f32 1.0, %v1034_v59 }
 0xca2   :  { %v1036_v11 = vmul.f32 %v1035_v61, %v1015_v1 }
 0xca4   :  { %v1037_v28 = vadd.f32 1.0, %v1036_v11 }
 0xca6   :  { %v1038_v0 = vmul.f32 %v1037_v28, %v1012_v62 }
 0xca8   :  { %1401 = vmatmul.mubr.msk.f32.vlgmr.msra.gmra.mrb[8].mxu0 %vm987_vm10, %v1038_v0 }
 0xd7b   :  { %v1112_v27 = vpop.f32.mrb[8].mxu0 }
 0xd7c   :  { %v1113_v29 = vadd.f32 %v1112_v27, %v1042_v26  ;;  %v1402_v30 = vpop.f32.mrb[9].mxu0 }
 0xd7e   :  { %v1116_v31 = vsel %vm987_vm10, %v1113_v29, 0.0 }
 0xd7f   :  { %1117 = vadd.xlane.f32.xlu1 %v1116_v31 }
 0xe0c   :  { %v1118_v24 = vpop.xlane.xlu1 %1117 }
 0xe0d   :  { %v1119_v4 = vmul.f32 0.03125, %v1118_v24 }
 0xe0f   :  { %v1120_v32 = vsub.f32 %v1113_v29, %v1119_v4 }
 0xe11   :  { %v1121_v33 = vmul.f32 %v1120_v32, %v1120_v32 }
 0xe13   :  { %v1122_v34 = vsel %vm987_vm10, %v1121_v33, 0.0 }
 0xe14   :  { %1123 = vadd.xlane.f32.xlu1 %v1122_v34 }
 0xea1   :  { %v1124_v35 = vpop.xlane.xlu1 %1123 }
 0xea2   :  { %v1125_v36 = vmul.f32 0.03125, %v1124_v35 }
 0xea4   :  { %v1126_v37 = vadd.f32 1e-05, %v1125_v36 }
 0xea6   :  { %1507 = vrsqrt.f32 %v1126_v37 }
 0xeb0   :  { %v1508_v40 = vpop.eup %1507 }
 0xeb1   :  { %v1128_v41 = vmul.f32 %v1508_v40, %v1120_v32 }
 0xeb3   :  { %v1133_v18 = vmul.f32 %v1132_v39, %v1128_v41 }
 0xeb5   :  { %v1138_v42 = vadd.f32 %v1137_v17, %v1133_v18 }
 0xeb7   :  { %v1140_v20 = vmul.f32 0.70710677, %v1138_v42  ;;  %v1139_v7 = vmul.f32 0.5, %v1138_v42 }
 0xeb9   :  { %v1143_v21 = vand.u32 2147483647, %v1140_v20  ;;  %vm1141_vm12 = vcmp.ge.f32.partialorder %v1140_v20, 0.0 }
 0xeba   :  { %v1142_v53 = vsel %vm1141_vm12, 1.0, %v1540_v38 }
 0xebb   :  { %v1144_v25 = vmul.f32 0.3275911, %v1143_v21  ;;  %v1157_v44 = vsub.f32 0.0, %v1143_v21 }
 0xebd   :  { %v1145_v43 = vadd.f32 1.0, %v1144_v25  ;;  %v1158_v13 = vmul.f32 %v1157_v44, %v1143_v21 }
 0xebf   :  { %1509 = vrcp.f32 %v1145_v43  ;;  %v1159_v15 = vmul.f32 1.442695, %v1158_v13 }
 0xec1   :  { %1511 = vpow2.f32 %v1159_v15 }
 0xec9   :  { %v1510_v45 = vpop.eup %1509 }
 0xeca   :  { %v1148_v14 = vmul.f32 1.0614054, %v1510_v45 }
 0xecb   :  { %v1512_v9 = vpop.eup %1511 }
 0xecc   :  { %v1149_v2 = vadd.f32 -1.4531521, %v1148_v14 }
 0xece   :  { %v1150_v58 = vmul.f32 %v1510_v45, %v1149_v2 }
 0xed0   :  { %v1151_v16 = vadd.f32 1.4214138, %v1150_v58 }
 0xed2   :  { %v1152_v3 = vmul.f32 %v1510_v45, %v1151_v16 }
 0xed4   :  { %v1153_v46 = vadd.f32 -0.28449672, %v1152_v3 }
 0xed6   :  { %v1154_v49 = vmul.f32 %v1510_v45, %v1153_v46 }
 0xed8   :  { %v1155_v47 = vadd.f32 0.2548296, %v1154_v49 }
 0xeda   :  { %v1156_v50 = vmul.f32 %v1510_v45, %v1155_v47 }
 0xedc   :  { %v1161_v51 = vmul.f32 %v1512_v9, %v1156_v50 }
 0xede   :  { %v1162_v19 = vsub.f32 1.0, %v1161_v51 }
 0xee0   :  { %v1163_v54 = vmul.f32 %v1162_v19, %v1142_v53 }
 0xee2   :  { %v1164_v10 = vadd.f32 1.0, %v1163_v54 }
 0xee4   :  { %v1165_v5 = vmul.f32 %v1164_v10, %v1139_v7 }
 0xee6   :  { %1412 = vmatmul.mubr.msk.f32.vlgmr.msra.gmra.mrb[10].mxu1 %vm987_vm10, %v1165_v5 }
 0xfb9   :  { %v1239_v22 = vpop.f32.mrb[10].mxu1 }
 0xfba   :  { %v1240_v55 = vadd.f32 %v1239_v22, %v1169_v6  ;;  %v1413_v57 = vpop.f32.mrb[11].mxu1 }
 0xfbc   :  { %v1243_v59 = vsel %vm51_vm2, %v1240_v55, 0.0 }
 0xfbd   :  { %1244 = vadd.xlane.f32.xlu1 %v1243_v59 }
 0xfce   :  { %1268 = vrot.lane.b32.xlu1 %v1834_v63, %s1541_s1  ;;  %v1264_v63 = vrot.slane %v1680_v23, %v984_v12 }
0x104a   :  { %v1245_v38 = vpop.xlane.xlu1 %1244 }
0x104b   :  { %v1246_v61 = vmul.f32 0.0625, %v1245_v38 }
0x104d   :  { %v1247_v1 = vsub.f32 %v1240_v55, %v1246_v61 }
0x104e   :  { %v1269_v4 = vpop.permute.xlu1 %1268 }
0x104f   :  { %v1248_v11 = vmul.f32 %v1247_v1, %v1247_v1 }
0x1051   :  { %v1249_v62 = vsel %vm51_vm2, %v1248_v11, 0.0 }
0x1052   :  { %1250 = vadd.xlane.f32.xlu0 %v1249_v62 }
0x10df   :  { %v1251_v28 = vpop.xlane.xlu0 %1250 }
0x10e0   :  { %v1252_v0 = vmul.f32 0.0625, %v1251_v28 }
0x10e2   :  { %v1253_v26 = vadd.f32 1e-05, %v1252_v0 }
0x10e4   :  { %1513 = vrsqrt.f32 %v1253_v26 }
0x10ee   :  { %v1514_v27 = vpop.eup %1513 }
0x10ef   :  { %v1255_v29 = vmul.f32 %v1514_v27, %v1247_v1 }
0x10f1   :  { %v1260_v30 = vmul.f32 %v1259_v48, %v1255_v29 }
0x10f3   :  { %v1265_v31 = vadd.f32 %v1264_v63, %v1260_v30 }
0x10f5   :  { %1515 = vtanh.f32 %v1265_v31 }
0x10ff   :  { %v1516_v24 = vpop.eup %1515 }
0x1100   :  { %1267 = vst.msk [vmem:[%s1900_s5] sm:$0xff] %vm51_vm2, %v1516_v24 }
0x1101   :  { %1272 = vst.msk [vmem:[%s1900_s5] sm:$0xff] %vm1271_vm13, %v1269_v4 }

</bundles_post_ra>
